<compile_context>
chip_gen: v7x
topology: tpu7x:2x2x1
jax: 0.10.0
libtpu: 0.0.40
codegen_flags: <defaults>
</compile_context>

<pallas_src>
import functools

import jax
import jax.numpy as jnp
from jax.experimental import pallas as pl
from jax.experimental.pallas import tpu as pltpu


def _round_up(x, m):
    return pl.cdiv(x, m) * m


def _biaffine_kernel(left_ref, right_ref, w_ref, out_ref, x_ref, *,
                     left_dim, right_dim):
    """One grid step over tile_m rows of the flattened (B*N) batch.

    x_ref ([tm, K_pad]) is filled with
        k = i*Dr + j        : left[:, i] * right[:, j]   (bilinear outer prod)
        k = Dl*Dr + i       : left[:, i]                 (left-linear)
        k = Dl*Dr + Dl + j  : right[:, j]                (right-linear)
        k >= Dl*Dr + Dl + Dr: 1.0                        (bias row + zero pad)
    then a single MXU matmul against the fused weight produces the output.
    """
    lf = left_ref[...]                                   # [tm, Dl]
    rf = right_ref[...]                                  # [tm, Dr]
    tm = lf.shape[0]
    dl, dr = left_dim, right_dim
    base = dl * dr

    # Outer product: per-column lane-broadcast of `left` against `right`.
    # Each slice is stored immediately -> bounded live ranges, no spills.
    for i in range(dl):
        x_ref[:, i * dr:(i + 1) * dr] = lf[:, i:i + 1] * rf

    # Linear-term lanes and the ones-tail (bias weight row + zero weight rows).
    x_ref[:, base:base + dl] = lf
    x_ref[:, base + dl:base + dl + dr] = rf
    tail = x_ref.shape[1] - (base + dl + dr)
    x_ref[:, base + dl + dr:] = jnp.ones((tm, tail), x_ref.dtype)

    # Single dense K-deep MXU matmul, f32 accumulation inside the MXU.
    out_ref[...] = jnp.dot(
        x_ref[...], w_ref[...], preferred_element_type=jnp.float32
    ).astype(out_ref.dtype)


def biaffine_forward(left, right, params, *, tile_m=256, compute_dtype=None):
    """Pallas implementation of Biaffine.forward.

    left:  [B, N, left_dim]
    right: [B, N, right_dim]
    returns [B, N, out_dim]
    """
    B, N, Dl = left.shape
    Bb, Nb, Dr = right.shape
    assert (B, N) == (Bb, Nb)

    wl, bl = params["left_w"], params["left_b"]           # [O, Dl], [O]
    wr, br = params["right_w"], params["right_b"]         # [O, Dr], [O]
    wb, bb = params["bilinear_w"], params["bilinear_b"]   # [O, Dl, Dr], [O]
    O = wl.shape[0]

    out_dtype = left.dtype
    dtype = out_dtype if compute_dtype is None else compute_dtype

    M = B * N
    # Clamp tile_m for small inputs (no 16 -> 256 row padding), keep 8-sublane
    # alignment, then pad M up to a whole number of tiles.
    tile_m = max(8, min(_round_up(tile_m, 8), _round_up(M, 8)))
    M_pad = _round_up(M, tile_m)

    # K-deep fused contraction dim: outer(Dl*Dr) | left(Dl) | right(Dr) | bias,
    # padded to a multiple of 128 lanes.
    K_core = Dl * Dr + Dl + Dr
    K_pad = _round_up(K_core + 1, 128)
    tail = K_pad - K_core                                 # >= 1

    left2 = left.reshape(M, Dl).astype(dtype)
    right2 = right.reshape(M, Dr).astype(dtype)
    if M_pad != M:
        left2 = jnp.pad(left2, ((0, M_pad - M), (0, 0)))
        right2 = jnp.pad(right2, ((0, M_pad - M), (0, 0)))

    # Fused weight [K_pad, O]:
    #   rows i*Dr + j       : Wb[o, i, j]        (bilinear)
    #   rows Dl*Dr + i      : Wl[o, i]           (left linear)
    #   rows Dl*Dr + Dl + j : Wr[o, j]           (right linear)
    #   row  K_core         : bl + br + bb       (fused bias; x lane is 1)
    #   remaining rows      : 0                  (x lanes are 1 -> no-op)
    wb_rows = jnp.transpose(wb, (1, 2, 0)).reshape(Dl * Dr, O)
    bias_row = (bl + br + bb).reshape(1, O)
    w_fused = jnp.concatenate(
        [wb_rows, wl.T, wr.T, bias_row,
         jnp.zeros((tail - 1, O), wb_rows.dtype)], axis=0).astype(dtype)

    # VMEM guard (double-buffered weight + in/out tiles + x_aug scratch) —
    # stays under the 16 MiB v5e scoped default / v7x's 64 MiB physical VMEM.
    isz = jnp.dtype(dtype).itemsize
    vmem_est = (2 * K_pad * O * isz                        # weight buffers
                + tile_m * K_pad * isz                     # x_aug scratch
                + 2 * tile_m * (Dl + Dr) * isz             # input tiles
                + 2 * tile_m * O * jnp.dtype(out_dtype).itemsize)
    assert vmem_est < 12 * 1024 * 1024, (
        f"tile_m={tile_m}, right_dim={Dr} -> ~{vmem_est} B of VMEM; "
        "reduce tile_m (or use compute_dtype=jnp.bfloat16)")

    kernel = functools.partial(_biaffine_kernel, left_dim=Dl, right_dim=Dr)

    out = pl.pallas_call(
        kernel,
        out_shape=jax.ShapeDtypeStruct((M_pad, O), out_dtype),
        grid_spec=pltpu.PrefetchScalarGridSpec(
            num_scalar_prefetch=0,
            grid=(M_pad // tile_m,),
            in_specs=[
                pl.BlockSpec((tile_m, Dl), lambda i: (i, 0)),
                pl.BlockSpec((tile_m, Dr), lambda i: (i, 0)),
                # Grid-invariant weight block: fetched once, reused every step.
                pl.BlockSpec((K_pad, O), lambda i: (0, 0)),
            ],
            out_specs=pl.BlockSpec((tile_m, O), lambda i: (i, 0)),
            scratch_shapes=[pltpu.VMEM((tile_m, K_pad), dtype)],
        ),
        compiler_params=pltpu.CompilerParams(
            dimension_semantics=("parallel",)),
    )(left2, right2, w_fused)

    return out[:M].reshape(B, N, O).astype(out_dtype)


def biaffine_reference(left, right, params):
    wl, bl = params["left_w"], params["left_b"]
    wr, br = params["right_w"], params["right_b"]
    wb, bb = params["bilinear_w"], params["bilinear_b"]
    lin = (jnp.einsum("bni,oi->bno", left, wl) + bl
           + jnp.einsum("bnj,oj->bno", right, wr) + br)
    bil = jnp.einsum("bni,oij,bnj->bno", left, wb, right) + bb
    return lin + bil


def init_params(key, left_dim, right_dim, out_dim):
    ks = jax.random.split(key, 6)
    s_l = 1.0 / jnp.sqrt(left_dim)
    s_r = 1.0 / jnp.sqrt(right_dim)
    return {
        "left_w": jax.random.uniform(ks[0], (out_dim, left_dim),
                                     jnp.float32, -s_l, s_l),
        "left_b": jax.random.uniform(ks[1], (out_dim,), jnp.float32, -s_l, s_l),
        "right_w": jax.random.uniform(ks[2], (out_dim, right_dim),
                                      jnp.float32, -s_r, s_r),
        "right_b": jax.random.uniform(ks[3], (out_dim,), jnp.float32, -s_r, s_r),
        "bilinear_w": jax.random.uniform(ks[4], (out_dim, left_dim, right_dim),
                                         jnp.float32, -s_l, s_l),
        "bilinear_b": jax.random.uniform(ks[5], (out_dim,), jnp.float32,
                                         -s_l, s_l),
    }


if __name__ == "__main__":
    B, N = 2, 8          # batch, seq
    LEFT_DIM, RIGHT_DIM, OUT_DIM = 32, 32, 128

    key = jax.random.PRNGKey(0)
    k_param, k_left, k_right = jax.random.split(key, 3)

    params = init_params(k_param, LEFT_DIM, RIGHT_DIM, OUT_DIM)
    left = jax.random.normal(k_left, (B, N, LEFT_DIM), jnp.float32)
    right = jax.random.normal(k_right, (B, N, RIGHT_DIM), jnp.float32)

    out = biaffine_forward(left, right, params, tile_m=256)
    out = jax.block_until_ready(out)

    ref = biaffine_reference(left, right, params)
    assert out.shape == (B, N, OUT_DIM)
    assert jnp.allclose(out, ref, atol=1e-3, rtol=1e-3), (
        f"max abs err {jnp.max(jnp.abs(out - ref))}")

    print("KERNEL_OK")
</pallas_src>

<mosaic_0001>
module attributes {stable_mosaic.version = 11 : i64} {
  func.func @_biaffine_kernel(%arg0: i32, %arg1: memref<16x32xf32, #tpu.memory_space<vmem>>, %arg2: memref<16x32xf32, #tpu.memory_space<vmem>>, %arg3: memref<1152x128xf32, #tpu.memory_space<vmem>>, %arg4: memref<16x128xf32, #tpu.memory_space<vmem>>, %arg5: memref<16x1152xf32, #tpu.memory_space<vmem>>) attributes {dimension_semantics = [#tpu.dimension_semantics<parallel>], iteration_bounds = array<i64: 1>, scalar_prefetch = 0 : i64, scratch_operands = 1 : i64, tpu.core_type = #tpu.core_type<tc>, window_params = [{transform_indices = @transform_0, window_bounds = array<i64: 16, 32>}, {transform_indices = @transform_1, window_bounds = array<i64: 16, 32>}, {pipeline_mode = #tpu.pipeline_mode<synchronous>, transform_indices = @transform_2, window_bounds = array<i64: 1152, 128>}, {transform_indices = @transform_3, window_bounds = array<i64: 16, 128>}]} {
    %c0 = arith.constant 0 : index
    %c0_0 = arith.constant 0 : index
    %0 = vector.load %arg1[%c0, %c0_0] : memref<16x32xf32, #tpu.memory_space<vmem>>, vector<16x32xf32>
    %c0_1 = arith.constant 0 : index
    %c0_2 = arith.constant 0 : index
    %1 = vector.load %arg2[%c0_1, %c0_2] : memref<16x32xf32, #tpu.memory_space<vmem>>, vector<16x32xf32>
    %2 = vector.extract_strided_slice %0 {offsets = [0, 0], sizes = [16, 1], strides = [1, 1]} : vector<16x32xf32> to vector<16x1xf32>
    %3 = vector.broadcast %2 : vector<16x1xf32> to vector<16x32xf32>
    %4 = arith.mulf %3, %1 : vector<16x32xf32>
    %c0_3 = arith.constant 0 : index
    %c0_4 = arith.constant 0 : index
    %5 = vector.load %arg5[%c0_3, %c0_4] : memref<16x1152xf32, #tpu.memory_space<vmem>>, vector<16x32xf32>
    tpu.vector_store %arg5[%c0_3, %c0_4], %4 {strides = array<i32>} : memref<16x1152xf32, #tpu.memory_space<vmem>>, vector<16x32xf32>,
    %6 = vector.extract_strided_slice %0 {offsets = [0, 1], sizes = [16, 1], strides = [1, 1]} : vector<16x32xf32> to vector<16x1xf32>
    %7 = vector.broadcast %6 : vector<16x1xf32> to vector<16x32xf32>
    %8 = arith.mulf %7, %1 : vector<16x32xf32>
    %c0_5 = arith.constant 0 : index
    %c32 = arith.constant 32 : index
    %9 = vector.load %arg5[%c0_5, %c32] : memref<16x1152xf32, #tpu.memory_space<vmem>>, vector<16x32xf32>
    tpu.vector_store %arg5[%c0_5, %c32], %8 {strides = array<i32>} : memref<16x1152xf32, #tpu.memory_space<vmem>>, vector<16x32xf32>,
    %10 = vector.extract_strided_slice %0 {offsets = [0, 2], sizes = [16, 1], strides = [1, 1]} : vector<16x32xf32> to vector<16x1xf32>
    %11 = vector.broadcast %10 : vector<16x1xf32> to vector<16x32xf32>
    %12 = arith.mulf %11, %1 : vector<16x32xf32>
    %c0_6 = arith.constant 0 : index
    %c64 = arith.constant 64 : index
    %13 = vector.load %arg5[%c0_6, %c64] : memref<16x1152xf32, #tpu.memory_space<vmem>>, vector<16x32xf32>
    tpu.vector_store %arg5[%c0_6, %c64], %12 {strides = array<i32>} : memref<16x1152xf32, #tpu.memory_space<vmem>>, vector<16x32xf32>,
    %14 = vector.extract_strided_slice %0 {offsets = [0, 3], sizes = [16, 1], strides = [1, 1]} : vector<16x32xf32> to vector<16x1xf32>
    %15 = vector.broadcast %14 : vector<16x1xf32> to vector<16x32xf32>
    %16 = arith.mulf %15, %1 : vector<16x32xf32>
    %c0_7 = arith.constant 0 : index
    %c96 = arith.constant 96 : index
    %17 = vector.load %arg5[%c0_7, %c96] : memref<16x1152xf32, #tpu.memory_space<vmem>>, vector<16x32xf32>
    tpu.vector_store %arg5[%c0_7, %c96], %16 {strides = array<i32>} : memref<16x1152xf32, #tpu.memory_space<vmem>>, vector<16x32xf32>,
    %18 = vector.extract_strided_slice %0 {offsets = [0, 4], sizes = [16, 1], strides = [1, 1]} : vector<16x32xf32> to vector<16x1xf32>
    %19 = vector.broadcast %18 : vector<16x1xf32> to vector<16x32xf32>
    %20 = arith.mulf %19, %1 : vector<16x32xf32>
    %c0_8 = arith.constant 0 : index
    %c128 = arith.constant 128 : index
    %21 = vector.load %arg5[%c0_8, %c128] : memref<16x1152xf32, #tpu.memory_space<vmem>>, vector<16x32xf32>
    tpu.vector_store %arg5[%c0_8, %c128], %20 {strides = array<i32>} : memref<16x1152xf32, #tpu.memory_space<vmem>>, vector<16x32xf32>,
    %22 = vector.extract_strided_slice %0 {offsets = [0, 5], sizes = [16, 1], strides = [1, 1]} : vector<16x32xf32> to vector<16x1xf32>
    %23 = vector.broadcast %22 : vector<16x1xf32> to vector<16x32xf32>
    %24 = arith.mulf %23, %1 : vector<16x32xf32>
    %c0_9 = arith.constant 0 : index
    %c160 = arith.constant 160 : index
    %25 = vector.load %arg5[%c0_9, %c160] : memref<16x1152xf32, #tpu.memory_space<vmem>>, vector<16x32xf32>
    tpu.vector_store %arg5[%c0_9, %c160], %24 {strides = array<i32>} : memref<16x1152xf32, #tpu.memory_space<vmem>>, vector<16x32xf32>,
    %26 = vector.extract_strided_slice %0 {offsets = [0, 6], sizes = [16, 1], strides = [1, 1]} : vector<16x32xf32> to vector<16x1xf32>
    %27 = vector.broadcast %26 : vector<16x1xf32> to vector<16x32xf32>
    %28 = arith.mulf %27, %1 : vector<16x32xf32>
    %c0_10 = arith.constant 0 : index
    %c192 = arith.constant 192 : index
    %29 = vector.load %arg5[%c0_10, %c192] : memref<16x1152xf32, #tpu.memory_space<vmem>>, vector<16x32xf32>
    tpu.vector_store %arg5[%c0_10, %c192], %28 {strides = array<i32>} : memref<16x1152xf32, #tpu.memory_space<vmem>>, vector<16x32xf32>,
    %30 = vector.extract_strided_slice %0 {offsets = [0, 7], sizes = [16, 1], strides = [1, 1]} : vector<16x32xf32> to vector<16x1xf32>
    %31 = vector.broadcast %30 : vector<16x1xf32> to vector<16x32xf32>
    %32 = arith.mulf %31, %1 : vector<16x32xf32>
    %c0_11 = arith.constant 0 : index
    %c224 = arith.constant 224 : index
    %33 = vector.load %arg5[%c0_11, %c224] : memref<16x1152xf32, #tpu.memory_space<vmem>>, vector<16x32xf32>
    tpu.vector_store %arg5[%c0_11, %c224], %32 {strides = array<i32>} : memref<16x1152xf32, #tpu.memory_space<vmem>>, vector<16x32xf32>,
    %34 = vector.extract_strided_slice %0 {offsets = [0, 8], sizes = [16, 1], strides = [1, 1]} : vector<16x32xf32> to vector<16x1xf32>
    %35 = vector.broadcast %34 : vector<16x1xf32> to vector<16x32xf32>
    %36 = arith.mulf %35, %1 : vector<16x32xf32>
    %c0_12 = arith.constant 0 : index
    %c256 = arith.constant 256 : index
    %37 = vector.load %arg5[%c0_12, %c256] : memref<16x1152xf32, #tpu.memory_space<vmem>>, vector<16x32xf32>
    tpu.vector_store %arg5[%c0_12, %c256], %36 {strides = array<i32>} : memref<16x1152xf32, #tpu.memory_space<vmem>>, vector<16x32xf32>,
    %38 = vector.extract_strided_slice %0 {offsets = [0, 9], sizes = [16, 1], strides = [1, 1]} : vector<16x32xf32> to vector<16x1xf32>
    %39 = vector.broadcast %38 : vector<16x1xf32> to vector<16x32xf32>
    %40 = arith.mulf %39, %1 : vector<16x32xf32>
    %c0_13 = arith.constant 0 : index
    %c288 = arith.constant 288 : index
    %41 = vector.load %arg5[%c0_13, %c288] : memref<16x1152xf32, #tpu.memory_space<vmem>>, vector<16x32xf32>
    tpu.vector_store %arg5[%c0_13, %c288], %40 {strides = array<i32>} : memref<16x1152xf32, #tpu.memory_space<vmem>>, vector<16x32xf32>,
    %42 = vector.extract_strided_slice %0 {offsets = [0, 10], sizes = [16, 1], strides = [1, 1]} : vector<16x32xf32> to vector<16x1xf32>
    %43 = vector.broadcast %42 : vector<16x1xf32> to vector<16x32xf32>
    %44 = arith.mulf %43, %1 : vector<16x32xf32>
    %c0_14 = arith.constant 0 : index
    %c320 = arith.constant 320 : index
    %45 = vector.load %arg5[%c0_14, %c320] : memref<16x1152xf32, #tpu.memory_space<vmem>>, vector<16x32xf32>
    tpu.vector_store %arg5[%c0_14, %c320], %44 {strides = array<i32>} : memref<16x1152xf32, #tpu.memory_space<vmem>>, vector<16x32xf32>,
    %46 = vector.extract_strided_slice %0 {offsets = [0, 11], sizes = [16, 1], strides = [1, 1]} : vector<16x32xf32> to vector<16x1xf32>
    %47 = vector.broadcast %46 : vector<16x1xf32> to vector<16x32xf32>
    %48 = arith.mulf %47, %1 : vector<16x32xf32>
    %c0_15 = arith.constant 0 : index
    %c352 = arith.constant 352 : index
    %49 = vector.load %arg5[%c0_15, %c352] : memref<16x1152xf32, #tpu.memory_space<vmem>>, vector<16x32xf32>
    tpu.vector_store %arg5[%c0_15, %c352], %48 {strides = array<i32>} : memref<16x1152xf32, #tpu.memory_space<vmem>>, vector<16x32xf32>,
    %50 = vector.extract_strided_slice %0 {offsets = [0, 12], sizes = [16, 1], strides = [1, 1]} : vector<16x32xf32> to vector<16x1xf32>
    %51 = vector.broadcast %50 : vector<16x1xf32> to vector<16x32xf32>
    %52 = arith.mulf %51, %1 : vector<16x32xf32>
    %c0_16 = arith.constant 0 : index
    %c384 = arith.constant 384 : index
    %53 = vector.load %arg5[%c0_16, %c384] : memref<16x1152xf32, #tpu.memory_space<vmem>>, vector<16x32xf32>
    tpu.vector_store %arg5[%c0_16, %c384], %52 {strides = array<i32>} : memref<16x1152xf32, #tpu.memory_space<vmem>>, vector<16x32xf32>,
    %54 = vector.extract_strided_slice %0 {offsets = [0, 13], sizes = [16, 1], strides = [1, 1]} : vector<16x32xf32> to vector<16x1xf32>
    %55 = vector.broadcast %54 : vector<16x1xf32> to vector<16x32xf32>
    %56 = arith.mulf %55, %1 : vector<16x32xf32>
    %c0_17 = arith.constant 0 : index
    %c416 = arith.constant 416 : index
    %57 = vector.load %arg5[%c0_17, %c416] : memref<16x1152xf32, #tpu.memory_space<vmem>>, vector<16x32xf32>
    tpu.vector_store %arg5[%c0_17, %c416], %56 {strides = array<i32>} : memref<16x1152xf32, #tpu.memory_space<vmem>>, vector<16x32xf32>,
    %58 = vector.extract_strided_slice %0 {offsets = [0, 14], sizes = [16, 1], strides = [1, 1]} : vector<16x32xf32> to vector<16x1xf32>
    %59 = vector.broadcast %58 : vector<16x1xf32> to vector<16x32xf32>
    %60 = arith.mulf %59, %1 : vector<16x32xf32>
    %c0_18 = arith.constant 0 : index
    %c448 = arith.constant 448 : index
    %61 = vector.load %arg5[%c0_18, %c448] : memref<16x1152xf32, #tpu.memory_space<vmem>>, vector<16x32xf32>
    tpu.vector_store %arg5[%c0_18, %c448], %60 {strides = array<i32>} : memref<16x1152xf32, #tpu.memory_space<vmem>>, vector<16x32xf32>,
    %62 = vector.extract_strided_slice %0 {offsets = [0, 15], sizes = [16, 1], strides = [1, 1]} : vector<16x32xf32> to vector<16x1xf32>
    %63 = vector.broadcast %62 : vector<16x1xf32> to vector<16x32xf32>
    %64 = arith.mulf %63, %1 : vector<16x32xf32>
    %c0_19 = arith.constant 0 : index
    %c480 = arith.constant 480 : index
    %65 = vector.load %arg5[%c0_19, %c480] : memref<16x1152xf32, #tpu.memory_space<vmem>>, vector<16x32xf32>
    tpu.vector_store %arg5[%c0_19, %c480], %64 {strides = array<i32>} : memref<16x1152xf32, #tpu.memory_space<vmem>>, vector<16x32xf32>,
    %66 = vector.extract_strided_slice %0 {offsets = [0, 16], sizes = [16, 1], strides = [1, 1]} : vector<16x32xf32> to vector<16x1xf32>
    %67 = vector.broadcast %66 : vector<16x1xf32> to vector<16x32xf32>
    %68 = arith.mulf %67, %1 : vector<16x32xf32>
    %c0_20 = arith.constant 0 : index
    %c512 = arith.constant 512 : index
    %69 = vector.load %arg5[%c0_20, %c512] : memref<16x1152xf32, #tpu.memory_space<vmem>>, vector<16x32xf32>
    tpu.vector_store %arg5[%c0_20, %c512], %68 {strides = array<i32>} : memref<16x1152xf32, #tpu.memory_space<vmem>>, vector<16x32xf32>,
    %70 = vector.extract_strided_slice %0 {offsets = [0, 17], sizes = [16, 1], strides = [1, 1]} : vector<16x32xf32> to vector<16x1xf32>
    %71 = vector.broadcast %70 : vector<16x1xf32> to vector<16x32xf32>
    %72 = arith.mulf %71, %1 : vector<16x32xf32>
    %c0_21 = arith.constant 0 : index
    %c544 = arith.constant 544 : index
    %73 = vector.load %arg5[%c0_21, %c544] : memref<16x1152xf32, #tpu.memory_space<vmem>>, vector<16x32xf32>
    tpu.vector_store %arg5[%c0_21, %c544], %72 {strides = array<i32>} : memref<16x1152xf32, #tpu.memory_space<vmem>>, vector<16x32xf32>,
    %74 = vector.extract_strided_slice %0 {offsets = [0, 18], sizes = [16, 1], strides = [1, 1]} : vector<16x32xf32> to vector<16x1xf32>
    %75 = vector.broadcast %74 : vector<16x1xf32> to vector<16x32xf32>
    %76 = arith.mulf %75, %1 : vector<16x32xf32>
    %c0_22 = arith.constant 0 : index
    %c576 = arith.constant 576 : index
    %77 = vector.load %arg5[%c0_22, %c576] : memref<16x1152xf32, #tpu.memory_space<vmem>>, vector<16x32xf32>
    tpu.vector_store %arg5[%c0_22, %c576], %76 {strides = array<i32>} : memref<16x1152xf32, #tpu.memory_space<vmem>>, vector<16x32xf32>,
    %78 = vector.extract_strided_slice %0 {offsets = [0, 19], sizes = [16, 1], strides = [1, 1]} : vector<16x32xf32> to vector<16x1xf32>
    %79 = vector.broadcast %78 : vector<16x1xf32> to vector<16x32xf32>
    %80 = arith.mulf %79, %1 : vector<16x32xf32>
    %c0_23 = arith.constant 0 : index
    %c608 = arith.constant 608 : index
    %81 = vector.load %arg5[%c0_23, %c608] : memref<16x1152xf32, #tpu.memory_space<vmem>>, vector<16x32xf32>
    tpu.vector_store %arg5[%c0_23, %c608], %80 {strides = array<i32>} : memref<16x1152xf32, #tpu.memory_space<vmem>>, vector<16x32xf32>,
    %82 = vector.extract_strided_slice %0 {offsets = [0, 20], sizes = [16, 1], strides = [1, 1]} : vector<16x32xf32> to vector<16x1xf32>
    %83 = vector.broadcast %82 : vector<16x1xf32> to vector<16x32xf32>
    %84 = arith.mulf %83, %1 : vector<16x32xf32>
    %c0_24 = arith.constant 0 : index
    %c640 = arith.constant 640 : index
    %85 = vector.load %arg5[%c0_24, %c640] : memref<16x1152xf32, #tpu.memory_space<vmem>>, vector<16x32xf32>
    tpu.vector_store %arg5[%c0_24, %c640], %84 {strides = array<i32>} : memref<16x1152xf32, #tpu.memory_space<vmem>>, vector<16x32xf32>,
    %86 = vector.extract_strided_slice %0 {offsets = [0, 21], sizes = [16, 1], strides = [1, 1]} : vector<16x32xf32> to vector<16x1xf32>
    %87 = vector.broadcast %86 : vector<16x1xf32> to vector<16x32xf32>
    %88 = arith.mulf %87, %1 : vector<16x32xf32>
    %c0_25 = arith.constant 0 : index
    %c672 = arith.constant 672 : index
    %89 = vector.load %arg5[%c0_25, %c672] : memref<16x1152xf32, #tpu.memory_space<vmem>>, vector<16x32xf32>
    tpu.vector_store %arg5[%c0_25, %c672], %88 {strides = array<i32>} : memref<16x1152xf32, #tpu.memory_space<vmem>>, vector<16x32xf32>,
    %90 = vector.extract_strided_slice %0 {offsets = [0, 22], sizes = [16, 1], strides = [1, 1]} : vector<16x32xf32> to vector<16x1xf32>
    %91 = vector.broadcast %90 : vector<16x1xf32> to vector<16x32xf32>
    %92 = arith.mulf %91, %1 : vector<16x32xf32>
    %c0_26 = arith.constant 0 : index
    %c704 = arith.constant 704 : index
    %93 = vector.load %arg5[%c0_26, %c704] : memref<16x1152xf32, #tpu.memory_space<vmem>>, vector<16x32xf32>
    tpu.vector_store %arg5[%c0_26, %c704], %92 {strides = array<i32>} : memref<16x1152xf32, #tpu.memory_space<vmem>>, vector<16x32xf32>,
    %94 = vector.extract_strided_slice %0 {offsets = [0, 23], sizes = [16, 1], strides = [1, 1]} : vector<16x32xf32> to vector<16x1xf32>
    %95 = vector.broadcast %94 : vector<16x1xf32> to vector<16x32xf32>
    %96 = arith.mulf %95, %1 : vector<16x32xf32>
    %c0_27 = arith.constant 0 : index
    %c736 = arith.constant 736 : index
    %97 = vector.load %arg5[%c0_27, %c736] : memref<16x1152xf32, #tpu.memory_space<vmem>>, vector<16x32xf32>
    tpu.vector_store %arg5[%c0_27, %c736], %96 {strides = array<i32>} : memref<16x1152xf32, #tpu.memory_space<vmem>>, vector<16x32xf32>,
    %98 = vector.extract_strided_slice %0 {offsets = [0, 24], sizes = [16, 1], strides = [1, 1]} : vector<16x32xf32> to vector<16x1xf32>
    %99 = vector.broadcast %98 : vector<16x1xf32> to vector<16x32xf32>
    %100 = arith.mulf %99, %1 : vector<16x32xf32>
    %c0_28 = arith.constant 0 : index
    %c768 = arith.constant 768 : index
    %101 = vector.load %arg5[%c0_28, %c768] : memref<16x1152xf32, #tpu.memory_space<vmem>>, vector<16x32xf32>
    tpu.vector_store %arg5[%c0_28, %c768], %100 {strides = array<i32>} : memref<16x1152xf32, #tpu.memory_space<vmem>>, vector<16x32xf32>,
    %102 = vector.extract_strided_slice %0 {offsets = [0, 25], sizes = [16, 1], strides = [1, 1]} : vector<16x32xf32> to vector<16x1xf32>
    %103 = vector.broadcast %102 : vector<16x1xf32> to vector<16x32xf32>
    %104 = arith.mulf %103, %1 : vector<16x32xf32>
    %c0_29 = arith.constant 0 : index
    %c800 = arith.constant 800 : index
    %105 = vector.load %arg5[%c0_29, %c800] : memref<16x1152xf32, #tpu.memory_space<vmem>>, vector<16x32xf32>
    tpu.vector_store %arg5[%c0_29, %c800], %104 {strides = array<i32>} : memref<16x1152xf32, #tpu.memory_space<vmem>>, vector<16x32xf32>,
    %106 = vector.extract_strided_slice %0 {offsets = [0, 26], sizes = [16, 1], strides = [1, 1]} : vector<16x32xf32> to vector<16x1xf32>
    %107 = vector.broadcast %106 : vector<16x1xf32> to vector<16x32xf32>
    %108 = arith.mulf %107, %1 : vector<16x32xf32>
    %c0_30 = arith.constant 0 : index
    %c832 = arith.constant 832 : index
    %109 = vector.load %arg5[%c0_30, %c832] : memref<16x1152xf32, #tpu.memory_space<vmem>>, vector<16x32xf32>
    tpu.vector_store %arg5[%c0_30, %c832], %108 {strides = array<i32>} : memref<16x1152xf32, #tpu.memory_space<vmem>>, vector<16x32xf32>,
    %110 = vector.extract_strided_slice %0 {offsets = [0, 27], sizes = [16, 1], strides = [1, 1]} : vector<16x32xf32> to vector<16x1xf32>
    %111 = vector.broadcast %110 : vector<16x1xf32> to vector<16x32xf32>
    %112 = arith.mulf %111, %1 : vector<16x32xf32>
    %c0_31 = arith.constant 0 : index
    %c864 = arith.constant 864 : index
    %113 = vector.load %arg5[%c0_31, %c864] : memref<16x1152xf32, #tpu.memory_space<vmem>>, vector<16x32xf32>
    tpu.vector_store %arg5[%c0_31, %c864], %112 {strides = array<i32>} : memref<16x1152xf32, #tpu.memory_space<vmem>>, vector<16x32xf32>,
    %114 = vector.extract_strided_slice %0 {offsets = [0, 28], sizes = [16, 1], strides = [1, 1]} : vector<16x32xf32> to vector<16x1xf32>
    %115 = vector.broadcast %114 : vector<16x1xf32> to vector<16x32xf32>
    %116 = arith.mulf %115, %1 : vector<16x32xf32>
    %c0_32 = arith.constant 0 : index
    %c896 = arith.constant 896 : index
    %117 = vector.load %arg5[%c0_32, %c896] : memref<16x1152xf32, #tpu.memory_space<vmem>>, vector<16x32xf32>
    tpu.vector_store %arg5[%c0_32, %c896], %116 {strides = array<i32>} : memref<16x1152xf32, #tpu.memory_space<vmem>>, vector<16x32xf32>,
    %118 = vector.extract_strided_slice %0 {offsets = [0, 29], sizes = [16, 1], strides = [1, 1]} : vector<16x32xf32> to vector<16x1xf32>
    %119 = vector.broadcast %118 : vector<16x1xf32> to vector<16x32xf32>
    %120 = arith.mulf %119, %1 : vector<16x32xf32>
    %c0_33 = arith.constant 0 : index
    %c928 = arith.constant 928 : index
    %121 = vector.load %arg5[%c0_33, %c928] : memref<16x1152xf32, #tpu.memory_space<vmem>>, vector<16x32xf32>
    tpu.vector_store %arg5[%c0_33, %c928], %120 {strides = array<i32>} : memref<16x1152xf32, #tpu.memory_space<vmem>>, vector<16x32xf32>,
    %122 = vector.extract_strided_slice %0 {offsets = [0, 30], sizes = [16, 1], strides = [1, 1]} : vector<16x32xf32> to vector<16x1xf32>
    %123 = vector.broadcast %122 : vector<16x1xf32> to vector<16x32xf32>
    %124 = arith.mulf %123, %1 : vector<16x32xf32>
    %c0_34 = arith.constant 0 : index
    %c960 = arith.constant 960 : index
    %125 = vector.load %arg5[%c0_34, %c960] : memref<16x1152xf32, #tpu.memory_space<vmem>>, vector<16x32xf32>
    tpu.vector_store %arg5[%c0_34, %c960], %124 {strides = array<i32>} : memref<16x1152xf32, #tpu.memory_space<vmem>>, vector<16x32xf32>,
    %126 = vector.extract_strided_slice %0 {offsets = [0, 31], sizes = [16, 1], strides = [1, 1]} : vector<16x32xf32> to vector<16x1xf32>
    %127 = vector.broadcast %126 : vector<16x1xf32> to vector<16x32xf32>
    %128 = arith.mulf %127, %1 : vector<16x32xf32>
    %c0_35 = arith.constant 0 : index
    %c992 = arith.constant 992 : index
    %129 = vector.load %arg5[%c0_35, %c992] : memref<16x1152xf32, #tpu.memory_space<vmem>>, vector<16x32xf32>
    tpu.vector_store %arg5[%c0_35, %c992], %128 {strides = array<i32>} : memref<16x1152xf32, #tpu.memory_space<vmem>>, vector<16x32xf32>,
    %c0_36 = arith.constant 0 : index
    %c1024 = arith.constant 1024 : index
    %130 = vector.load %arg5[%c0_36, %c1024] : memref<16x1152xf32, #tpu.memory_space<vmem>>, vector<16x32xf32>
    tpu.vector_store %arg5[%c0_36, %c1024], %0 {strides = array<i32>} : memref<16x1152xf32, #tpu.memory_space<vmem>>, vector<16x32xf32>,
    %c0_37 = arith.constant 0 : index
    %c1056 = arith.constant 1056 : index
    %131 = vector.load %arg5[%c0_37, %c1056] : memref<16x1152xf32, #tpu.memory_space<vmem>>, vector<16x32xf32>
    tpu.vector_store %arg5[%c0_37, %c1056], %1 {strides = array<i32>} : memref<16x1152xf32, #tpu.memory_space<vmem>>, vector<16x32xf32>,
    %cst = arith.constant 1.000000e+00 : f32
    %132 = vector.broadcast %cst : f32 to vector<16x64xf32>
    %c0_38 = arith.constant 0 : index
    %c1088 = arith.constant 1088 : index
    %133 = vector.load %arg5[%c0_38, %c1088] : memref<16x1152xf32, #tpu.memory_space<vmem>>, vector<16x64xf32>
    tpu.vector_store %arg5[%c0_38, %c1088], %132 {strides = array<i32>} : memref<16x1152xf32, #tpu.memory_space<vmem>>, vector<16x64xf32>,
    %c0_39 = arith.constant 0 : index
    %c0_40 = arith.constant 0 : index
    %134 = vector.load %arg5[%c0_39, %c0_40] : memref<16x1152xf32, #tpu.memory_space<vmem>>, vector<16x1152xf32>
    %c0_41 = arith.constant 0 : index
    %c0_42 = arith.constant 0 : index
    %135 = vector.load %arg3[%c0_41, %c0_42] : memref<1152x128xf32, #tpu.memory_space<vmem>>, vector<1152x128xf32>
    %cst_43 = arith.constant dense<0.000000e+00> : vector<16x128xf32>
    %136 = tpu.matmul %134, %135, %cst_43 {dimension_numbers = #tpu.dot_dimension_numbers<[1], [0], [0], [1], [0, 0, 1, 1], [], []>} : vector<16x1152xf32>, vector<1152x128xf32>, vector<16x128xf32> -> vector<16x128xf32>
    %c0_44 = arith.constant 0 : index
    %c0_45 = arith.constant 0 : index
    %137 = vector.load %arg4[%c0_44, %c0_45] : memref<16x128xf32, #tpu.memory_space<vmem>>, vector<16x128xf32>
    tpu.vector_store %arg4[%c0_44, %c0_45], %136 {strides = array<i32>} : memref<16x128xf32, #tpu.memory_space<vmem>>, vector<16x128xf32>,
    return
  }
  func.func @transform_0(%arg0: i32) -> (i32, i32) {
    %c0_i32 = arith.constant 0 : i32
    %c0_i32_0 = arith.constant 0 : i32
    return %arg0, %c0_i32 : i32, i32
  }
  func.func @transform_1(%arg0: i32) -> (i32, i32) {
    %c0_i32 = arith.constant 0 : i32
    %c0_i32_0 = arith.constant 0 : i32
    return %arg0, %c0_i32 : i32, i32
  }
  func.func @transform_2(%arg0: i32) -> (i32, i32) {
    %c0_i32 = arith.constant 0 : i32
    %c0_i32_0 = arith.constant 0 : i32
    %c0_i32_1 = arith.constant 0 : i32
    return %c0_i32, %c0_i32_0 : i32, i32
  }
  func.func @transform_3(%arg0: i32) -> (i32, i32) {
    %c0_i32 = arith.constant 0 : i32
    %c0_i32_0 = arith.constant 0 : i32
    return %arg0, %c0_i32 : i32, i32
  }
}

</mosaic_0001>

<bundles_post_ra>
// kernel: tpu_custom_call.1
= control target key start
LH: loop header
LB: loop body
LE: loop exit
PB: predicated region body
PF: predicated region fallthrough
CT: control target
= control target key end

     0   :  { %8 = vsyncpa [#allocation4], 0  ;;  %s2240_s0 = inlined_call_operand.hbm [shape: f32[16,32], index: 0, kind: input, shape index: {}]   ;;  %s2241_s1 = inlined_call_operand.hbm [shape: f32[16,32], index: 1, kind: input, shape index: {}]   ;;  %s2242_s2 = inlined_call_operand.hbm [shape: f32[1152,128], index: 2, kind: input, shape index: {}]   ;;  %s2243_s3 = inlined_call_operand.hbm [shape: f32[16,128], index: 3, kind: output, shape index: {}]  }
   0x1   :  { %9 = vsyncpa [#allocation7], 0 }
   0x2   :  { %10 = vsyncpa [#allocation5], 0  ;;  %s1776_s12 = smov [#allocation6]   ;;  %s1777_s14 = smov [#allocation3]  }
   0x3   :  { %s28_s13 = sshll.u32 %s1776_s12, 4  ;;  %s16_s15 = sshll.u32 %s1777_s14, 4  ;;  %s29_s13 = int_to_ptr.vmem [resolvable:$true] %s28_s13  ;;  %s1838_s15 = int_to_ptr.vmem [resolvable:$true] %s16_s15 }
   0x4   :  { %s1682_s18 = scalar_lea.hbm %s2241_s1, 256 }
   0x5   :  { %p1683_p0 = scmp.ne.s32.totalorder %s2241_s1, %s1682_s18  ;;  %p1686_p1 = scmp.lt.u32.totalorder %s1682_s18, %s2241_s1 }
   0x7   :  { %p1688_p2 = pnand %p1686_p1, %p1683_p0 }
   0x9   :  { %1691 = shalt.err (!%p1688_p2)
}
   0xa   :  { %s1692_s23 = scalar_lea.vmem %s29_s13, 256  ;;  %p1697_p4 = scmp.lt.s32.totalorder %s29_s13, %s29_s13 }
   0xb   :  { %p1693_p3 = scmp.ne.s32.totalorder %s29_s13, %s1692_s23  ;;  %p1698_p5 = scmp.lt.s32.totalorder %s1692_s23, %s1692_s23 }
   0xd   :  { %p1699_p6 = por %p1698_p5, %p1697_p4 }
   0xf   :  { %p1700_p7 = pnand %p1699_p6, %p1693_p3 }
  0x11   :  { %1703 = shalt.err (!%p1700_p7)
}
  0x12   :  { %s1778_s24 = smov 128   ;;  %s1779_s25 = smov 8  }
  0x13   :  { %34 = dma.hbm_to_vmem [thread:$0]  %s2241_s1, 256, %s29_s13, [#allocation7], %s1778_s24, %s1778_s24, %s1779_s25  }
  0x14   :  { %s1704_s30 = scalar_lea.hbm %s2240_s0, 256 }
  0x15   :  { %p1705_p8 = scmp.ne.s32.totalorder %s2240_s0, %s1704_s30  ;;  %p1708_p9 = scmp.lt.u32.totalorder %s1704_s30, %s2240_s0 }
  0x17   :  { %p1710_p10 = pnand %p1708_p9, %p1705_p8 }
  0x19   :  { %1713 = shalt.err (!%p1710_p10)
}
  0x1a   :  { %s1714_s8 = scalar_lea.vmem %s1838_s15, 256  ;;  %p1719_p12 = scmp.lt.s32.totalorder %s1838_s15, %s1838_s15 }
  0x1b   :  { %p1715_p11 = scmp.ne.s32.totalorder %s1838_s15, %s1714_s8  ;;  %p1720_p13 = scmp.lt.s32.totalorder %s1714_s8, %s1714_s8 }
  0x1d   :  { %p1721_p0 = por %p1720_p13, %p1719_p12 }
  0x1f   :  { %p1722_p1 = pnand %p1721_p0, %p1715_p11 }
  0x21   :  { %1725 = shalt.err (!%p1722_p1)
}
  0x22   :  { %22 = dma.hbm_to_vmem [thread:$0]  %s2240_s0, 256, %s1838_s15, [#allocation4], %s1778_s24, %s1778_s24, %s1779_s25  }
  0x23   :  { %s1780_s10 = smov [#allocation8]   ;;  %s1726_s14 = scalar_lea.hbm %s2242_s2, 18432 }
  0x24   :  { %s40_s11 = sshll.u32 %s1780_s10, 4  ;;  %p1727_p2 = scmp.ne.s32.totalorder %s2242_s2, %s1726_s14  ;;  %s41_s11 = int_to_ptr.vmem [resolvable:$true] %s40_s11 }
  0x25   :  { %p1730_p3 = scmp.lt.u32.totalorder %s1726_s14, %s2242_s2 }
  0x27   :  { %p1732_p4 = pnand %p1730_p3, %p1727_p2 }
  0x29   :  { %1735 = shalt.err (!%p1732_p4)
}
  0x2a   :  { %s1736_s20 = scalar_lea.vmem %s41_s11, 18432  ;;  %p1741_p6 = scmp.lt.s32.totalorder %s41_s11, %s41_s11 }
  0x2b   :  { %p1737_p5 = scmp.ne.s32.totalorder %s41_s11, %s1736_s20  ;;  %p1742_p7 = scmp.lt.s32.totalorder %s1736_s20, %s1736_s20 }
  0x2d   :  { %p1743_p8 = por %p1742_p7, %p1741_p6 }
  0x2f   :  { %p1744_p9 = pnand %p1743_p8, %p1737_p5 }
  0x31   :  { %1747 = shalt.err (!%p1744_p9)
}
  0x32   :  { %46 = dma.hbm_to_vmem [thread:$0]  %s2242_s2, 18432, %s41_s11, [#allocation7], %s1778_s24, %s1778_s24, %s1779_s25  }
  0x33   :  { %1770 = dma.done.wait [#allocation4], 256  }
  0x34   :  { %1771 = vsyncadd [#allocation4], 4294967040 }
  0x35   :  { %1772 = dma.done.wait [#allocation7], 18688  }
  0x36   :  { %1773 = vsyncadd [#allocation7], 4294948608  ;;  %v1781_v0 = vmov 6   ;;  %v1782_v1 = vmov 5   ;;  %v1890_v2 = vld [vmem:[#allocation3] sm:$0xff]  ;;  %v1783_v3 = vmov 2  }
  0x37   :  { %1623 = vset.pattern.permute.xlu1 %v1781_v0  ;;  %1621 = vset.pattern.permute.xlu0 %v1782_v1  ;;  %v1784_v4 = vmov 1   ;;  %v1896_v5 = vld [vmem:[#allocation3 + $0x8] sm:$0xff]  ;;  %v1785_v6 = vmov 7   ;;  %v1786_v7 = vmov 13   ;;  %v1787_v8 = vmov 3   ;;  %v1946_v27 = vld [vmem:[#allocation6] sm:$0xff] }
  0x38   :  { %171 = vperm.xlu1 %1623, %v1890_v2   ;;  %151 = vperm.xlu0 %1621, %v1890_v2   ;;  %v1788_v9 = vmov 9   ;;  %v1789_v10 = vmov 22   ;;  %v1790_v11 = vmov 10   ;;  %v1791_v12 = vmov 14   ;;  %s1807_s2 = smov 32   ;;  %s1808_s21 = smov 64  }
  0x39   :  { %v1792_v13 = vmov 15   ;;  %v1793_v14 = vmov 11   ;;  %v1794_v15 = vmov 30   ;;  %v1795_v16 = vmov 17   ;;  %s1809_s22 = smov 96   ;;  %v691_v40 = vld [vmem:[#allocation8 + $0x80] sm:$0xff] }
  0x3a   :  { %v1796_v17 = vmov 21   ;;  %v1797_v18 = vmov 18   ;;  %v1798_v19 = vmov 19   ;;  %v1799_v20 = vmov 23   ;;  %v692_v41 = vld [vmem:[#allocation8 + $0x88] sm:$0xff]  ;;  %v675_v44 = vld [vmem:[#allocation8] sm:$0xff] }
  0x3b   :  { %v1800_v21 = vmov 26   ;;  %v1801_v22 = vmov 0   ;;  %v1802_v23 = vmov 29   ;;  %v1803_v24 = vmov 25   ;;  %v676_v45 = vld [vmem:[#allocation8 + $0x8] sm:$0xff]  ;;  %v693_v49 = vld [vmem:[#allocation8 + $0x90] sm:$0xff] }
  0x3c   :  { %1624 = vset.pattern.permute.xlu1 %v1783_v3  ;;  %1622 = vset.pattern.permute.xlu0 %v1784_v4  ;;  %vm72_vm0 = vcmask 261120   ;;  %v1804_v25 = vmov 4   ;;  %v1805_v26 = vmov 31   ;;  %v1806_v31 = vmov 27   ;;  %v694_v50 = vld [vmem:[#allocation8 + $0x98] sm:$0xff]  ;;  %v677_v52 = vld [vmem:[#allocation8 + $0x10] sm:$0xff] }
  0x3d   :  { %97 = vperm.xlu1 %1624, %v1890_v2   ;;  %76 = vperm.xlu0 %1622, %v1890_v2   ;;  %642 = vst.msk [vmem:[#allocation2 + $0x40] sm:$0xff] %vm72_vm0, %v1890_v2  ;;  %643 = vst.msk [vmem:[#allocation2 + $0x88] sm:$0xff] %vm72_vm0, %v1896_v5  ;;  %v1419_v43 = vpack.c.bf16 %v692_v41, %v691_v40  ;;  %v1421_v47 = vpack.c.bf16 %v676_v45, %v675_v44  ;;  %v1810_v48 = vmov 12   ;;  %v678_v53 = vld [vmem:[#allocation8 + $0x18] sm:$0xff]  ;;  %v695_v58 = vld [vmem:[#allocation8 + $0xa0] sm:$0xff]  ;;  %vm93_vm1 = vcmask 523520  }
  0x3e   :  { %v1423_v51 = vpack.c.bf16 %v694_v50, %v693_v49  ;;  %v1425_v56 = vpack.c.bf16 %v678_v53, %v677_v52  ;;  %v696_v59 = vld [vmem:[#allocation8 + $0xa8] sm:$0xff]  ;;  %v679_v61 = vld [vmem:[#allocation8 + $0x20] sm:$0xff]  ;;  %v689_v49 = vld [vmem:[#allocation8 + $0x70] sm:$0xff]  ;;  %vm114_vm2 = vcmask 785920   ;;  %vm135_vm3 = vcmask 1048320   ;;  %s1817_s23 = smov [#allocation9]  }
  0x3f   :  { %1420 = vmatprep.subr.bf16.mxu0 %v1419_v43  ;;  %v1427_v60 = vpack.c.bf16 %v696_v59, %v695_v58  ;;  %v680_v62 = vld [vmem:[#allocation8 + $0x28] sm:$0xff]  ;;  %v687_v41 = vld [vmem:[#allocation8 + $0x60] sm:$0xff]  ;;  %vm654_vm4 = vcmask 1048064   ;;  %s1201_s26 = sshll.u32 %s1817_s23, 4  ;;  %s1202_s26 = int_to_ptr.vmem [resolvable:$true] %s1201_s26 }
  0x40   :  { %1422 = vmatpush3.bf16.msra.mxu0 %v1421_v47  ;;  %v1429_v63 = vpack.c.bf16 %v680_v62, %v679_v61  ;;  %v688_v43 = vld [vmem:[#allocation8 + $0x68] sm:$0xff]  ;;  %v706_v47 = vld [vmem:[#allocation8 + $0xf8] sm:$0xff]  ;;  %v725_v61 = vld [vmem:[#allocation8 + $0x190] sm:$0xff]  ;;  %s1748_s27 = scalar_lea.vmem %s1202_s26, 256  ;;  %p1753_p11 = scmp.lt.s32.totalorder %s1202_s26, %s1202_s26 }
  0x41   :  { %1625 = vset.pattern.permute.xlu1 %v1785_v6  ;;  %1632 = vset.pattern.permute.xlu0 %v1781_v0  ;;  %v1445_v44 = vpack.c.bf16 %v688_v43, %v687_v41  ;;  %v724_v52 = vld [vmem:[#allocation8 + $0x188] sm:$0xff]  ;;  %v726_v62 = vld [vmem:[#allocation8 + $0x198] sm:$0xff]  ;;  %p1749_p10 = scmp.ne.s32.totalorder %s1202_s26, %s1748_s27  ;;  %p1754_p12 = scmp.lt.s32.totalorder %s1748_s27, %s1748_s27 }
  0x42   :  { %191 = vperm.xlu1 %1625, %v1890_v2   ;;  %175 = vperm.xlu0 %1632, %v1896_v5   ;;  %v708_v58 = vld [vmem:[#allocation8 + $0x108] sm:$0xff] }
  0x43   :  { %1424 = vmatprep.subr.bf16.mxu0 %v1423_v51  ;;  %v723_v51 = vld [vmem:[#allocation8 + $0x180] sm:$0xff]  ;;  %p1755_p13 = por %p1754_p12, %p1753_p11 }
  0x44   :  { %1426 = vmatpush3.bf16.msra.mxu0 %v1425_v56  ;;  %v707_v56 = vld [vmem:[#allocation8 + $0x100] sm:$0xff] }
  0x45   :  { %1428 = vmatprep.subr.bf16.mxu0 %v1427_v60  ;;  %v1453_v60 = vpack.c.bf16 %v708_v58, %v707_v56  ;;  %p1756_p0 = pnand %p1755_p13, %p1749_p10 }
  0x46   :  { %1626 = vset.pattern.permute.xlu1 %v1786_v7  ;;  %1633 = vset.pattern.permute.xlu0 %v1787_v8  ;;  %v681_v8 = vld [vmem:[#allocation8 + $0x30] sm:$0xff] }
  0x47   :  { %295 = vperm.xlu1 %1626, %v1890_v2   ;;  %118 = vperm.xlu0 %1633, %v1890_v2  }
  0x48   :  { %1430 = vmatpush3.bf16.msra.mxu0 %v1429_v63  ;;  %v1455_v63 = vpack.c.bf16 %v726_v62, %v725_v61  ;;  %v737_v61 = vld [vmem:[#allocation8 + $0x1f0] sm:$0xff]  ;;  %v738_v62 = vld [vmem:[#allocation8 + $0x1f8] sm:$0xff] }
  0x4b   :  { %1627 = vset.pattern.permute.xlu1 %v1788_v9  ;;  %122 = vperm.xlu0 %1633, %v1896_v5  }
  0x4c   :  { %223 = vperm.xlu1 %1627, %v1890_v2  }
  0x4f   :  { %1638 = vset.pattern.permute.xlu0 %v1789_v10 }
  0x50   :  { %1628 = vset.pattern.permute.xlu1 %v1790_v11  ;;  %459 = vperm.xlu0 %1638, %v1890_v2  }
  0x51   :  { %243 = vperm.xlu1 %1628, %v1890_v2  }
  0x54   :  { %1639 = vset.pattern.permute.xlu0 %v1791_v12  ;;  %v699_v12 = vld [vmem:[#allocation8 + $0xc0] sm:$0xff] }
  0x55   :  { %1629 = vset.pattern.permute.xlu1 %v1792_v13  ;;  %315 = vperm.xlu0 %1639, %v1890_v2  }
  0x56   :  { %335 = vperm.xlu1 %1629, %v1890_v2  }
  0x59   :  { %319 = vperm.xlu0 %1639, %v1896_v5  }
  0x5a   :  { %1630 = vset.pattern.permute.xlu1 %v1782_v1 }
  0x5b   :  { %155 = vperm.xlu1 %1630, %v1896_v5  }
  0x5d   :  { %1644 = vset.pattern.permute.xlu0 %v1793_v14 }
  0x5e   :  { %263 = vperm.xlu0 %1644, %v1890_v2  }
  0x5f   :  { %1631 = vset.pattern.permute.xlu1 %v1784_v4  ;;  %v697_v4 = vld [vmem:[#allocation8 + $0xb0] sm:$0xff] }
  0x60   :  { %80 = vperm.xlu1 %1631, %v1896_v5  }
  0x62   :  { %267 = vperm.xlu0 %1644, %v1896_v5  }
  0x64   :  { %1634 = vset.pattern.permute.xlu1 %v1783_v3 }
  0x65   :  { %101 = vperm.xlu1 %1634, %v1896_v5  }
  0x66   :  { %1649 = vset.pattern.permute.xlu0 %v1794_v15 }
  0x67   :  { %603 = vperm.xlu0 %1649, %v1890_v2  }
  0x69   :  { %1635 = vset.pattern.permute.xlu1 %v1785_v6  ;;  %v698_v6 = vld [vmem:[#allocation8 + $0xb8] sm:$0xff] }
  0x6a   :  { %195 = vperm.xlu1 %1635, %v1896_v5  }
  0x6b   :  { %1654 = vset.pattern.permute.xlu0 %v1795_v16 }
  0x6c   :  { %371 = vperm.xlu0 %1654, %v1896_v5  }
  0x6e   :  { %1636 = vset.pattern.permute.xlu1 %v1796_v17 }
  0x6f   :  { %439 = vperm.xlu1 %1636, %v1890_v2  }
  0x70   :  { %1657 = vset.pattern.permute.xlu0 %v1797_v18 }
  0x71   :  { %391 = vperm.xlu0 %1657, %v1896_v5  }
  0x73   :  { %1637 = vset.pattern.permute.xlu1 %v1795_v16 }
  0x74   :  { %367 = vperm.xlu1 %1637, %v1890_v2  }
  0x75   :  { %1658 = vset.pattern.permute.xlu0 %v1798_v19  ;;  %v684_v19 = vld [vmem:[#allocation8 + $0x48] sm:$0xff] }
  0x76   :  { %407 = vperm.xlu0 %1658, %v1890_v2  }
  0x78   :  { %1640 = vset.pattern.permute.xlu1 %v1797_v18  ;;  %v683_v18 = vld [vmem:[#allocation8 + $0x40] sm:$0xff] }
  0x79   :  { %387 = vperm.xlu1 %1640, %v1890_v2  }
  0x7a   :  { %411 = vperm.xlu0 %1658, %v1896_v5  }
  0x7d   :  { %1641 = vset.pattern.permute.xlu1 %v1799_v20 }
  0x7e   :  { %479 = vperm.xlu1 %1641, %v1890_v2   ;;  %1661 = vset.pattern.permute.xlu0 %v1800_v21 }
  0x7f   :  { %531 = vperm.xlu0 %1661, %v1890_v2  }
  0x82   :  { %1642 = vset.pattern.permute.xlu1 %v1786_v7  ;;  %v1431_v7 = vpack.c.bf16 %v698_v6, %v697_v4 }
  0x83   :  { %299 = vperm.xlu1 %1642, %v1896_v5   ;;  %535 = vperm.xlu0 %1661, %v1896_v5  }
  0x84   :  { %1432 = vmatprep.subr.bf16.mxu0 %v1431_v7  ;;  %v727_v7 = vld [vmem:[#allocation8 + $0x1a0] sm:$0xff] }
  0x87   :  { %1643 = vset.pattern.permute.xlu1 %v1788_v9  ;;  %1668 = vset.pattern.permute.xlu0 %v1801_v22  ;;  %v682_v9 = vld [vmem:[#allocation8 + $0x38] sm:$0xff] }
  0x88   :  { %227 = vperm.xlu1 %1643, %v1896_v5  }
  0x8c   :  { %1645 = vset.pattern.permute.xlu1 %v1790_v11 }
  0x8d   :  { %247 = vperm.xlu1 %1645, %v1896_v5  }
  0x91   :  { %1646 = vset.pattern.permute.xlu1 %v1792_v13  ;;  %v700_v13 = vld [vmem:[#allocation8 + $0xc8] sm:$0xff] }
  0x92   :  { %339 = vperm.xlu1 %1646, %v1896_v5  }
  0x96   :  { %1647 = vset.pattern.permute.xlu1 %v1802_v23 }
  0x97   :  { %583 = vperm.xlu1 %1647, %v1890_v2  }
  0x9b   :  { %1648 = vset.pattern.permute.xlu1 %v1803_v24 }
  0x9c   :  { %511 = vperm.xlu1 %1648, %v1890_v2  }
  0xa0   :  { %1650 = vset.pattern.permute.xlu1 %v1804_v25 }
  0xa1   :  { %139 = vperm.xlu1 %1650, %v1890_v2  }
  0xa5   :  { %1651 = vset.pattern.permute.xlu1 %v1796_v17  ;;  %v1435_v17 = vpack.c.bf16 %v700_v13, %v699_v12  ;;  %v712_v12 = vld [vmem:[#allocation8 + $0x128] sm:$0xff] }
  0xa6   :  { %443 = vperm.xlu1 %1651, %v1896_v5  }
  0xaa   :  { %1652 = vset.pattern.permute.xlu1 %v1805_v26 }
  0xab   :  { %623 = vperm.xlu1 %1652, %v1890_v2  }
  0xaf   :  { %1653 = vset.pattern.permute.xlu1 %v1801_v22  ;;  %v1811_v22 = vmov 8  }
  0xb0   :  { %62 = vperm.xlu1 %1653, %v1890_v2  }
  0xb4   :  { %1655 = vset.pattern.permute.xlu1 %v1789_v10  ;;  %v1433_v10 = vpack.c.bf16 %v682_v9, %v681_v8  ;;  %v728_v8 = vld [vmem:[#allocation8 + $0x1a8] sm:$0xff]  ;;  %v1812_v9 = vmov 20  }
  0xb5   :  { %463 = vperm.xlu1 %1655, %v1896_v5  }
  0xb6   :  { %1434 = vmatpush3.bf16.msra.mxu0 %v1433_v10  ;;  %v1459_v10 = vpack.c.bf16 %v728_v8, %v727_v7  ;;  %v1814_v7 = vmov 24  }
  0xb7   :  { %v172_v28 = vpop.permute.xlu1 %171  ;;  %v152_v29 = vpop.permute.xlu0 %151  ;;  %1436 = vmatprep.subr.bf16.mxu0 %v1435_v17  ;;  %v729_v17 = vld [vmem:[#allocation8 + $0x1b0] sm:$0xff] }
  0xb8   :  { %v158_v30 = vmul.f32 %v152_v29, %v1946_v27  ;;  %v178_v32 = vmul.f32 %v172_v28, %v1946_v27 }
  0xb9   :  { %1656 = vset.pattern.permute.xlu1 %v1806_v31 }
  0xba   :  { %551 = vperm.xlu1 %1656, %v1890_v2   ;;  %162 = vrot.lane.b32.xlu0 %v158_v30, %s1807_s2  ;;  %v685_v30 = vld [vmem:[#allocation8 + $0x50] sm:$0xff] }
  0xbc   :  { %v1953_v33 = vpop.permute.xlu1 %97  ;;  %v1955_v34 = vpop.permute.xlu0 %76 }
  0xbd   :  { %v83_v14 = vmul.f32 %v1955_v34, %v1946_v27  ;;  %v104_v28 = vmul.f32 %v1953_v33, %v1946_v27  ;;  %v704_v33 = vld [vmem:[#allocation8 + $0xe8] sm:$0xff] }
  0xbe   :  { %1659 = vset.pattern.permute.xlu1 %v1799_v20  ;;  %182 = vrot.lane.b32.xlu0 %v178_v32, %s1808_s21  ;;  %v1437_v20 = vpack.c.bf16 %v684_v19, %v683_v18  ;;  %v730_v18 = vld [vmem:[#allocation8 + $0x1b8] sm:$0xff]  ;;  %v713_v19 = vld [vmem:[#allocation8 + $0x130] sm:$0xff] }
  0xbf   :  { %483 = vperm.xlu1 %1659, %v1896_v5  }
  0xc0   :  { %1438 = vmatpush3.bf16.msra.mxu0 %v1437_v20  ;;  %v714_v20 = vld [vmem:[#allocation8 + $0x138] sm:$0xff] }
  0xc1   :  { %v192_v35 = vpop.permute.xlu1 %191  ;;  %v1959_v36 = vpop.permute.xlu0 %175 }
  0xc2   :  { %v198_v37 = vmul.f32 %v192_v35, %v1946_v27 }
  0xc3   :  { %1660 = vset.pattern.permute.xlu1 %v1802_v23  ;;  %v701_v23 = vld [vmem:[#allocation8 + $0xd0] sm:$0xff] }
  0xc4   :  { %587 = vperm.xlu1 %1660, %v1896_v5   ;;  %202 = vrot.lane.b32.xlu0 %v198_v37, %s1809_s22 }
  0xc6   :  { %v296_v38 = vpop.permute.xlu1 %295  ;;  %v1964_v39 = vpop.permute.xlu0 %118 }
  0xc7   :  { %v302_v54 = vmul.f32 %v296_v38, %v1946_v27  ;;  %v125_v35 = vmul.f32 %v1964_v39, %v1946_v27  ;;  %v703_v38 = vld [vmem:[#allocation8 + $0xe0] sm:$0xff]  ;;  %v705_v39 = vld [vmem:[#allocation8 + $0xf0] sm:$0xff] }
  0xc8   :  { %1662 = vset.pattern.permute.xlu1 %v1803_v24  ;;  %67 = vperm.xlu0 %1668, %v1896_v5   ;;  %v702_v24 = vld [vmem:[#allocation8 + $0xd8] sm:$0xff]  ;;  %v1443_v40 = vpack.c.bf16 %v704_v33, %v703_v38  ;;  %v733_v33 = vld [vmem:[#allocation8 + $0x1d0] sm:$0xff] }
  0xc9   :  { %515 = vperm.xlu1 %1662, %v1896_v5   ;;  %v1439_v29 = vpack.c.bf16 %v702_v24, %v701_v23  ;;  %v1465_v23 = vpack.c.bf16 %v714_v20, %v713_v19 }
  0xca   :  { %v1968_v42 = vpop.permute.xlu0 %122 }
  0xcb   :  { %v1970_v46 = vpop.permute.xlu1 %223  ;;  %1440 = vmatprep.subr.bf16.mxu0 %v1439_v29  ;;  %v732_v29 = vld [vmem:[#allocation8 + $0x1c8] sm:$0xff] }
  0xcc   :  { %1669 = vset.pattern.permute.xlu0 %v1810_v48  ;;  %v1447_v48 = vpack.c.bf16 %v706_v47, %v705_v39  ;;  %v717_v39 = vld [vmem:[#allocation8 + $0x150] sm:$0xff] }
  0xcd   :  { %1663 = vset.pattern.permute.xlu1 %v1794_v15  ;;  %283 = vperm.xlu0 %1669, %v1890_v2   ;;  %v1990_v15 = vld [vmem:[#allocation6 + $0x8] sm:$0xff] }
  0xce   :  { %607 = vperm.xlu1 %1663, %v1896_v5   ;;  %v179_v37 = vmul.f32 %v1959_v36, %v1990_v15  ;;  %v690_v36 = vld [vmem:[#allocation8 + $0x78] sm:$0xff] }
  0xcf   :  { %v1976_v55 = vpop.permute.xlu0 %459  ;;  %v1449_v50 = vpack.c.bf16 %v690_v36, %v689_v49  ;;  %v735_v36 = vld [vmem:[#allocation8 + $0x1e0] sm:$0xff] }
  0xd0   :  { %v1978_v57 = vpop.permute.xlu1 %243 }
  0xd1   :  { %306 = vrot.lane.b32.xlu0 %v302_v54, %s1807_s2  ;;  %v1451_v54 = vpack.c.bf16 %v724_v52, %v723_v51  ;;  %v250_v41 = vmul.f32 %v1978_v57, %v1946_v27  ;;  %v755_v51 = vld [vmem:[#allocation8 + $0x280] sm:$0xff]  ;;  %v756_v52 = vld [vmem:[#allocation8 + $0x288] sm:$0xff] }
  0xd2   :  { %1664 = vset.pattern.permute.xlu1 %v1805_v26  ;;  %v1483_v58 = vpack.c.bf16 %v756_v52, %v755_v51 }
  0xd3   :  { %627 = vperm.xlu1 %1664, %v1896_v5   ;;  %1452 = vmatprep.subr.bf16.mxu1 %v1451_v54  ;;  %v720_v54 = vld [vmem:[#allocation8 + $0x168] sm:$0xff] }
  0xd4   :  { %v316_v0 = vpop.permute.xlu0 %315  ;;  %1454 = vmatpush3.bf16.msra.mxu1 %v1453_v60 }
  0xd5   :  { %v322_v1 = vmul.f32 %v316_v0, %v1946_v27  ;;  %v336_v3 = vpop.permute.xlu1 %335  ;;  %v709_v0 = vld [vmem:[#allocation8 + $0x110] sm:$0xff]  ;;  %1456 = vmatprep.subr.bf16.mxu1 %v1455_v63 }
  0xd6   :  { %v342_v11 = vmul.f32 %v336_v3, %v1946_v27 }
  0xd7   :  { %1665 = vset.pattern.permute.xlu1 %v1806_v31  ;;  %326 = vrot.lane.b32.xlu0 %v322_v1, %s1808_s21  ;;  %v686_v31 = vld [vmem:[#allocation8 + $0x58] sm:$0xff] }
  0xd8   :  { %555 = vperm.xlu1 %1665, %v1896_v5   ;;  %v1441_v34 = vpack.c.bf16 %v686_v31, %v685_v30  ;;  %v710_v1 = vld [vmem:[#allocation8 + $0x118] sm:$0xff]  ;;  %v230_v30 = vmul.f32 %v1970_v46, %v1946_v27 }
  0xd9   :  { %v1457_v4 = vpack.c.bf16 %v710_v1, %v709_v0  ;;  %v718_v46 = vld [vmem:[#allocation8 + $0x158] sm:$0xff]  ;;  %v1479_v0 = vpack.c.bf16 %v738_v62, %v737_v61  ;;  %v721_v1 = vld [vmem:[#allocation8 + $0x170] sm:$0xff] }
  0xda   :  { %v156_v16 = vpop.permute.xlu1 %155  ;;  %1442 = vmatpush3.bf16.msra.mxu0 %v1441_v34  ;;  %v715_v34 = vld [vmem:[#allocation8 + $0x140] sm:$0xff] }
  0xdb   :  { %346 = vrot.lane.b32.xlu0 %v342_v11, %s1809_s22  ;;  %v159_v21 = vmul.f32 %v156_v16, %v1990_v15  ;;  %1444 = vmatprep.subr.bf16.mxu0 %v1443_v40  ;;  %v711_v11 = vld [vmem:[#allocation8 + $0x120] sm:$0xff]  ;;  %v2023_v16 = vpop.permute.xlu0 %319  ;;  %v734_v40 = vld [vmem:[#allocation8 + $0x1d8] sm:$0xff] }
  0xdc   :  { %87 = vrot.lane.b32.xlu1 %v83_v14, %s1807_s2  ;;  %1458 = vmatpush3.bf16.msra.mxu1 %v1457_v4  ;;  %v1461_v13 = vpack.c.bf16 %v712_v12, %v711_v11  ;;  %v1815_v11 = vmov 28  }
  0xdd   :  { %1666 = vset.pattern.permute.xlu1 %v1811_v22  ;;  %1460 = vmatprep.subr.bf16.mxu1 %v1459_v10  ;;  %v126_v10 = vmul.f32 %v1968_v42, %v1990_v15 }
  0xde   :  { %1446 = vmatpush3.bf16.msra.mxu0 %v1445_v44  ;;  %v1471_v44 = vpack.c.bf16 %v734_v40, %v733_v33 }
  0xdf   :  { %v1998_v32 = vpop.permute.xlu1 %80  ;;  %164 = vrot.lane.b32.xlu0 %v159_v21, %s1807_s2  ;;  %1448 = vmatprep.subr.bf16.mxu0 %v1447_v48  ;;  %v1813_v21 = vmov 16   ;;  %v1473_v48 = vpack.c.bf16 %v718_v46, %v717_v39  ;;  %v787_v39 = vld [vmem:[#allocation8 + $0x380] sm:$0xff]  ;;  %v788_v46 = vld [vmem:[#allocation8 + $0x388] sm:$0xff] }
  0xe0   :  { %108 = vrot.lane.b32.xlu1 %v104_v28, %s1808_s21  ;;  %1462 = vmatpush3.bf16.msra.mxu1 %v1461_v13  ;;  %v731_v28 = vld [vmem:[#allocation8 + $0x1c0] sm:$0xff]  ;;  %v84_v63 = vmul.f32 %v1998_v32, %v1990_v15 }
  0xe1   :  { %v1467_v31 = vpack.c.bf16 %v732_v29, %v731_v28 }
  0xe2   :  { %1450 = vmatpush3.bf16.msra.mxu0 %v1449_v50  ;;  %v736_v50 = vld [vmem:[#allocation8 + $0x1e8] sm:$0xff] }
  0xe3   :  { %184 = vrot.lane.b32.xlu0 %v179_v37, %s1808_s21  ;;  %v264_v37 = vpop.permute.xlu0 %263  ;;  %v1475_v57 = vpack.c.bf16 %v736_v50, %v735_v36  ;;  %1484 = vmatprep.subr.bf16.mxu0 %v1483_v58 }
  0xe4   :  { %v2007_v45 = vpop.permute.xlu1 %101  ;;  %129 = vrot.lane.b32.xlu1 %v125_v35, %s1809_s22  ;;  %v716_v35 = vld [vmem:[#allocation8 + $0x148] sm:$0xff]  ;;  %v270_v49 = vmul.f32 %v264_v37, %v1946_v27 }
  0xe5   :  { %v1469_v38 = vpack.c.bf16 %v716_v35, %v715_v34  ;;  %v105_v8 = vmul.f32 %v2007_v45, %v1990_v15 }
  0xe8   :  { %211 = vperm.xlu1 %1666, %v1890_v2  }
  0xe9   :  { %v196_v53 = vpop.permute.xlu1 %195 }
  0xea   :  { %v199_v59 = vmul.f32 %v196_v53, %v1990_v15  ;;  %v719_v53 = vld [vmem:[#allocation8 + $0x160] sm:$0xff] }
  0xec   :  { %1667 = vset.pattern.permute.xlu1 %v1804_v25  ;;  %204 = vrot.lane.b32.xlu0 %v199_v59, %s1809_s22  ;;  %v466_v25 = vmul.f32 %v1976_v55, %v1946_v27  ;;  %v1463_v55 = vpack.c.bf16 %v730_v18, %v729_v17  ;;  %v1477_v59 = vpack.c.bf16 %v720_v54, %v719_v53 }
  0xed   :  { %143 = vperm.xlu1 %1667, %v1896_v5  }
  0xee   :  { %v440_v3 = vpop.permute.xlu1 %439  ;;  %1464 = vmatprep.subr.bf16.mxu1 %v1463_v55 }
  0xef   :  { %v446_v6 = vmul.f32 %v440_v3, %v1946_v27  ;;  %1466 = vmatpush3.bf16.msra.mxu1 %v1465_v23  ;;  %v722_v3 = vld [vmem:[#allocation8 + $0x178] sm:$0xff] }
  0xf0   :  { %1468 = vmatprep.subr.bf16.mxu1 %v1467_v31  ;;  %v1481_v4 = vpack.c.bf16 %v722_v3, %v721_v1 }
  0xf1   :  { %1670 = vset.pattern.permute.xlu1 %v1812_v9  ;;  %450 = vrot.lane.b32.xlu0 %v446_v6, %s1807_s2 }
  0xf2   :  { %427 = vperm.xlu1 %1670, %v1890_v2  }
  0xf3   :  { %v2021_v14 = vpop.permute.xlu1 %367  ;;  %1470 = vmatpush3.bf16.msra.mxu1 %v1469_v38 }
  0xf4   :  { %1472 = vmatprep.subr.bf16.mxu1 %v1471_v44  ;;  %v374_v13 = vmul.f32 %v2021_v14, %v1946_v27 }
  0xf5   :  { %470 = vrot.lane.b32.xlu0 %v466_v25, %s1808_s21 }
  0xf6   :  { %1671 = vset.pattern.permute.xlu1 %v1813_v21 }
  0xf7   :  { %355 = vperm.xlu1 %1671, %v1890_v2   ;;  %1474 = vmatpush3.bf16.msra.mxu1 %v1473_v48 }
  0xf8   :  { %v2028_v24 = vpop.permute.xlu1 %387  ;;  %1476 = vmatprep.subr.bf16.mxu1 %v1475_v57 }
  0xf9   :  { %v394_v18 = vmul.f32 %v2028_v24, %v1946_v27 }
  0xfb   :  { %234 = vrot.lane.b32.xlu1 %v230_v30, %s1807_s2  ;;  %1478 = vmatpush3.bf16.msra.mxu1 %v1477_v59 }
  0xfc   :  { %1672 = vset.pattern.permute.xlu1 %v1811_v22  ;;  %v268_v22 = vpop.permute.xlu0 %267  ;;  %1480 = vmatprep.subr.bf16.mxu1 %v1479_v0 }
  0xfd   :  { %v480_v43 = vpop.permute.xlu1 %479  ;;  %v271_v14 = vmul.f32 %v268_v22, %v1990_v15 }
  0xfe   :  { %v486_v47 = vmul.f32 %v480_v43, %v1946_v27 }
  0xff   :  { %254 = vrot.lane.b32.xlu1 %v250_v41, %s1808_s21  ;;  %1482 = vmatpush3.bf16.msra.mxu1 %v1481_v4 }
 0x100   :  { %490 = vrot.lane.b32.xlu0 %v486_v47, %s1809_s22  ;;  %v2044_v60 = vpop.permute.xlu0 %603  ;;  %v323_v47 = vmul.f32 %v2023_v16, %v1990_v15 }
 0x101   :  { %v610_v52 = vmul.f32 %v2044_v60, %v1946_v27 }
 0x102   :  { %v2040_v56 = vpop.permute.xlu1 %299 }
 0x103   :  { %274 = vrot.lane.b32.xlu1 %v270_v49, %s1809_s22  ;;  %v303_v43 = vmul.f32 %v2040_v56, %v1990_v15  ;;  %v1515_v49 = vpack.c.bf16 %v788_v46, %v787_v39  ;;  %v762_v39 = vld [vmem:[#allocation8 + $0x2b8] sm:$0xff] }
 0x104   :  { %287 = vperm.xlu0 %1669, %v1896_v5   ;;  %v2052_v25 = vpop.permute.xlu0 %371 }
 0x105   :  { %1516 = vmatprep.subr.bf16.mxu1 %v1515_v49  ;;  %v375_v62 = vmul.f32 %v2052_v25, %v1990_v15 }
 0x107   :  { %v228_v6 = vpop.permute.xlu1 %227  ;;  %89 = vrot.lane.b32.xlu1 %v84_v63, %s1807_s2 }
 0x108   :  { %1674 = vset.pattern.permute.xlu0 %v1814_v7  ;;  %v231_v12 = vmul.f32 %v228_v6, %v1990_v15  ;;  %v392_v45 = vpop.permute.xlu0 %391 }
 0x109   :  { %499 = vperm.xlu0 %1674, %v1890_v2  }
 0x10b   :  { %110 = vrot.lane.b32.xlu1 %v105_v8, %s1808_s21 }
 0x10c   :  { %v248_v32 = vpop.permute.xlu1 %247  ;;  %v408_v55 = vpop.permute.xlu0 %407 }
 0x10d   :  { %1677 = vset.pattern.permute.xlu0 %v1815_v11  ;;  %v251_v42 = vmul.f32 %v248_v32, %v1990_v15  ;;  %v414_v20 = vmul.f32 %v408_v55, %v1946_v27 }
 0x10e   :  { %575 = vperm.xlu0 %1677, %v1896_v5  }
 0x10f   :  { %131 = vrot.lane.b32.xlu1 %v126_v10, %s1809_s22 }
 0x111   :  { %v2062_v17 = vpop.permute.xlu1 %339 }
 0x112   :  { %236 = vrot.lane.b32.xlu0 %v231_v12, %s1807_s2  ;;  %v343_v22 = vmul.f32 %v2062_v17, %v1990_v15 }
 0x113   :  { %378 = vrot.lane.b32.xlu1 %v374_v13, %s1807_s2  ;;  %1679 = vset.pattern.permute.xlu0 %v1805_v26  ;;  %v2076_v26 = vpop.permute.xlu0 %411 }
 0x114   :  { %v415_v10 = vmul.f32 %v2076_v26, %v1990_v15  ;;  %v757_v26 = vld [vmem:[#allocation8 + $0x290] sm:$0xff] }
 0x116   :  { %v584_v19 = vpop.permute.xlu1 %583  ;;  %256 = vrot.lane.b32.xlu0 %v251_v42, %s1808_s21 }
 0x117   :  { %398 = vrot.lane.b32.xlu1 %v394_v18, %s1808_s21  ;;  %v532_v29 = vpop.permute.xlu0 %531  ;;  %v590_v51 = vmul.f32 %v584_v19, %v1946_v27 }
 0x118   :  { %v538_v53 = vmul.f32 %v532_v29, %v1946_v27 }
 0x11a   :  { %276 = vrot.lane.b32.xlu0 %v271_v14, %s1809_s22  ;;  %v740_v14 = vld [vmem:[#allocation8 + $0x208] sm:$0xff] }
 0x11b   :  { %v512_v23 = vpop.permute.xlu1 %511  ;;  %418 = vrot.lane.b32.xlu1 %v414_v20, %s1809_s22  ;;  %v536_v35 = vpop.permute.xlu0 %535  ;;  %v739_v20 = vld [vmem:[#allocation8 + $0x200] sm:$0xff] }
 0x11c   :  { %v518_v28 = vmul.f32 %v512_v23, %v1946_v27  ;;  %v539_v61 = vmul.f32 %v536_v35, %v1990_v15  ;;  %v1485_v29 = vpack.c.bf16 %v740_v14, %v739_v20  ;;  %v804_v20 = vld [vmem:[#allocation8 + $0x408] sm:$0xff] }
 0x11e   :  { %522 = vrot.lane.b32.xlu0 %v518_v28, %s1807_s2  ;;  %v758_v28 = vld [vmem:[#allocation8 + $0x298] sm:$0xff] }
 0x11f   :  { %215 = vperm.xlu1 %1672, %v1896_v5  }
 0x120   :  { %v140_v24 = vpop.permute.xlu1 %139 }
 0x121   :  { %v146_v30 = vmul.f32 %v140_v24, %v1946_v27 }
 0x123   :  { %148 = vst.msk [vmem:[#allocation2 + $0x8] sm:$0xff] %vm72_vm0, %v146_v30  ;;  %1673 = vset.pattern.permute.xlu1 %v1815_v11  ;;  %v1487_v30 = vpack.c.bf16 %v758_v28, %v757_v26  ;;  %v771_v26 = vld [vmem:[#allocation8 + $0x300] sm:$0xff]  ;;  %v772_v28 = vld [vmem:[#allocation8 + $0x308] sm:$0xff] }
 0x124   :  { %571 = vperm.xlu1 %1673, %v1890_v2  }
 0x125   :  { %v444_v31 = vpop.permute.xlu1 %443 }
 0x126   :  { %v447_v34 = vmul.f32 %v444_v31, %v1990_v15  ;;  %v741_v31 = vld [vmem:[#allocation8 + $0x210] sm:$0xff] }
 0x128   :  { %452 = vrot.lane.b32.xlu0 %v447_v34, %s1807_s2  ;;  %1675 = vset.pattern.permute.xlu1 %v1812_v9  ;;  %v742_v34 = vld [vmem:[#allocation8 + $0x218] sm:$0xff] }
 0x129   :  { %431 = vperm.xlu1 %1675, %v1896_v5  }
 0x12a   :  { %v624_v37 = vpop.permute.xlu1 %623 }
 0x12b   :  { %v630_v38 = vmul.f32 %v624_v37, %v1946_v27  ;;  %v759_v37 = vld [vmem:[#allocation8 + $0x2a0] sm:$0xff] }
 0x12c   :  { %v163_v33 = vpop.permute.xlu0 %162 }
 0x12d   :  { %168 = vst.msk [vmem:[#allocation2 + $0x8] sm:$0xff] %vm93_vm1, %v163_v33  ;;  %634 = vrot.lane.b32.xlu0 %v630_v38, %s1809_s22  ;;  %1676 = vset.pattern.permute.xlu1 %v1813_v21  ;;  %v760_v38 = vld [vmem:[#allocation8 + $0x2a8] sm:$0xff] }
 0x12e   :  { %359 = vperm.xlu1 %1676, %v1896_v5  }
 0x12f   :  { %v63_v2 = vpop.permute.xlu1 %62 }
 0x130   :  { %v70_v40 = vmul.f32 %v63_v2, %v1946_v27  ;;  %v183_v9 = vpop.permute.xlu0 %182 }
 0x131   :  { %188 = vst.msk [vmem:[#allocation2 + $0x8] sm:$0xff] %vm114_vm2, %v183_v9  ;;  %v1489_v9 = vpack.c.bf16 %v742_v34, %v741_v31 }
 0x132   :  { %73 = vst.msk [vmem:[#allocation2] sm:$0xff] %vm72_vm0, %v70_v40  ;;  %1678 = vset.pattern.permute.xlu1 %v1814_v7 }
 0x133   :  { %503 = vperm.xlu1 %1678, %v1896_v5   ;;  %v395_v5 = vmul.f32 %v392_v45, %v1990_v15 }
 0x134   :  { %v464_v41 = vpop.permute.xlu1 %463 }
 0x135   :  { %v467_v21 = vmul.f32 %v464_v41, %v1990_v15  ;;  %v1491_v41 = vpack.c.bf16 %v760_v38, %v759_v37 }
 0x136   :  { %v203_v44 = vpop.permute.xlu0 %202 }
 0x137   :  { %208 = vst.msk [vmem:[#allocation2 + $0x8] sm:$0xff] %vm135_vm3, %v203_v44  ;;  %472 = vrot.lane.b32.xlu0 %v467_v21, %s1808_s21  ;;  %308 = vrot.lane.b32.xlu1 %v303_v43, %s1807_s2  ;;  %v743_v43 = vld [vmem:[#allocation8 + $0x220] sm:$0xff]  ;;  %v744_v21 = vld [vmem:[#allocation8 + $0x228] sm:$0xff]  ;;  %v761_v44 = vld [vmem:[#allocation8 + $0x2b0] sm:$0xff] }
 0x138   :  { %v1495_v49 = vpack.c.bf16 %v762_v39, %v761_v44  ;;  %v775_v39 = vld [vmem:[#allocation8 + $0x320] sm:$0xff] }
 0x139   :  { %v552_v48 = vpop.permute.xlu1 %551 }
 0x13a   :  { %v558_v3 = vmul.f32 %v552_v48, %v1946_v27 }
 0x13b   :  { %400 = vrot.lane.b32.xlu0 %v395_v5, %s1808_s21  ;;  %328 = vrot.lane.b32.xlu1 %v323_v47, %s1808_s21  ;;  %v1493_v47 = vpack.c.bf16 %v744_v21, %v743_v43  ;;  %v792_v43 = vld [vmem:[#allocation8 + $0x3a8] sm:$0xff] }
 0x13e   :  { %v484_v36 = vpop.permute.xlu1 %483  ;;  %v658_v50 = vld [vmem:[#allocation2 + $0x8] sm:$0xff] }
 0x13f   :  { %348 = vrot.lane.b32.xlu1 %v343_v22, %s1809_s22  ;;  %883 = vmatprep.mubr.f32.mxu0 %v658_v50  ;;  %v487_v7 = vmul.f32 %v484_v36, %v1990_v15  ;;  %v745_v22 = vld [vmem:[#allocation8 + $0x230] sm:$0xff]  ;;  %v746_v36 = vld [vmem:[#allocation8 + $0x238] sm:$0xff]  ;;  %v763_v50 = vld [vmem:[#allocation8 + $0x2c0] sm:$0xff] }
 0x143   :  { %v588_v16 = vpop.permute.xlu1 %587  ;;  %594 = vrot.lane.b32.xlu1 %v590_v51, %s1807_s2  ;;  %v764_v51 = vld [vmem:[#allocation8 + $0x2c8] sm:$0xff] }
 0x144   :  { %v591_v57 = vmul.f32 %v588_v16, %v1990_v15  ;;  %v1497_v16 = vpack.c.bf16 %v746_v36, %v745_v22 }
 0x146   :  { %596 = vrot.lane.b32.xlu0 %v591_v57, %s1807_s2 }
 0x147   :  { %614 = vrot.lane.b32.xlu1 %v610_v52, %s1808_s21  ;;  %v68_v54 = vpop.permute.xlu0 %67 }
 0x148   :  { %v516_v56 = vpop.permute.xlu1 %515  ;;  %v71_v58 = vmul.f32 %v68_v54, %v1990_v15  ;;  %v747_v54 = vld [vmem:[#allocation8 + $0x240] sm:$0xff] }
 0x149   :  { %v519_v59 = vmul.f32 %v516_v56, %v1990_v15  ;;  %v748_v56 = vld [vmem:[#allocation8 + $0x248] sm:$0xff] }
 0x14a   :  { %74 = vst.msk [vmem:[#allocation2 + $0x48] sm:$0xff] %vm72_vm0, %v71_v58 }
 0x14b   :  { %524 = vrot.lane.b32.xlu0 %v519_v59, %s1807_s2  ;;  %542 = vrot.lane.b32.xlu1 %v538_v53, %s1808_s21  ;;  %v1499_v53 = vpack.c.bf16 %v764_v51, %v763_v50  ;;  %v765_v59 = vld [vmem:[#allocation8 + $0x2d0] sm:$0xff] }
 0x14c   :  { %v284_v60 = vpop.permute.xlu0 %283  ;;  %v777_v51 = vld [vmem:[#allocation8 + $0x330] sm:$0xff] }
 0x14d   :  { %v290_v63 = vmul.f32 %v284_v60, %v1946_v27  ;;  %v608_v0 = vpop.permute.xlu1 %607 }
 0x14e   :  { %v611_v45 = vmul.f32 %v608_v0, %v1990_v15 }
 0x14f   :  { %292 = vst.msk [vmem:[#allocation2 + $0x18] sm:$0xff] %vm72_vm0, %v290_v63  ;;  %380 = vrot.lane.b32.xlu1 %v375_v62, %s1807_s2  ;;  %544 = vrot.lane.b32.xlu0 %v539_v61, %s1808_s21  ;;  %v766_v61 = vld [vmem:[#allocation8 + $0x2d8] sm:$0xff]  ;;  %v1501_v62 = vpack.c.bf16 %v748_v56, %v747_v54 }
 0x150   :  { %v307_v1 = vpop.permute.xlu0 %306  ;;  %v1503_v0 = vpack.c.bf16 %v766_v61, %v765_v59  ;;  %v779_v59 = vld [vmem:[#allocation8 + $0x340] sm:$0xff]  ;;  %v780_v61 = vld [vmem:[#allocation8 + $0x348] sm:$0xff] }
 0x151   :  { %312 = vst.msk [vmem:[#allocation2 + $0x18] sm:$0xff] %vm93_vm1, %v307_v1  ;;  %v749_v1 = vld [vmem:[#allocation8 + $0x250] sm:$0xff] }
 0x152   :  { %v628_v4 = vpop.permute.xlu1 %627 }
 0x153   :  { %562 = vrot.lane.b32.xlu1 %v558_v3, %s1809_s22  ;;  %v631_v18 = vmul.f32 %v628_v4, %v1990_v15  ;;  %v750_v3 = vld [vmem:[#allocation8 + $0x258] sm:$0xff]  ;;  %v767_v4 = vld [vmem:[#allocation8 + $0x2e0] sm:$0xff] }
 0x154   :  { %v327_v6 = vpop.permute.xlu0 %326 }
 0x155   :  { %332 = vst.msk [vmem:[#allocation2 + $0x18] sm:$0xff] %vm114_vm2, %v327_v6  ;;  %v768_v6 = vld [vmem:[#allocation8 + $0x2e8] sm:$0xff] }
 0x157   :  { %v556_v8 = vpop.permute.xlu1 %555  ;;  %492 = vrot.lane.b32.xlu1 %v487_v7, %s1809_s22  ;;  %v1505_v7 = vpack.c.bf16 %v750_v3, %v749_v1  ;;  %v1533_v3 = vpack.c.bf16 %v780_v61, %v779_v59  ;;  %v818_v59 = vld [vmem:[#allocation8 + $0x478] sm:$0xff] }
 0x158   :  { %v559_v25 = vmul.f32 %v556_v8, %v1990_v15  ;;  %v347_v32 = vpop.permute.xlu0 %346 }
 0x159   :  { %352 = vst.msk [vmem:[#allocation2 + $0x18] sm:$0xff] %vm135_vm3, %v347_v32  ;;  %v751_v32 = vld [vmem:[#allocation8 + $0x260] sm:$0xff] }
 0x15a   :  { %564 = vrot.lane.b32.xlu0 %v559_v25, %s1809_s22  ;;  %v1507_v25 = vpack.c.bf16 %v768_v6, %v767_v4 }
 0x15b   :  { %v88_v11 = vpop.permute.xlu1 %87  ;;  %420 = vrot.lane.b32.xlu1 %v415_v10, %s1809_s22  ;;  %v752_v10 = vld [vmem:[#allocation8 + $0x268] sm:$0xff] }
 0x15c   :  { %94 = vst.msk [vmem:[#allocation2] sm:$0xff] %vm93_vm1, %v88_v11  ;;  %v165_v12 = vpop.permute.xlu0 %164  ;;  %v769_v11 = vld [vmem:[#allocation8 + $0x2f0] sm:$0xff] }
 0x15e   :  { %648 = vrot.lane.b32.xlu0 %v1990_v15, %s1807_s2 }
 0x15f   :  { %v109_v13 = vpop.permute.xlu1 %108  ;;  %616 = vrot.lane.b32.xlu1 %v611_v45, %s1808_s21  ;;  %v1509_v45 = vpack.c.bf16 %v752_v10, %v751_v32  ;;  %v799_v32 = vld [vmem:[#allocation8 + $0x3e0] sm:$0xff]  ;;  %v800_v10 = vld [vmem:[#allocation8 + $0x3e8] sm:$0xff] }
 0x160   :  { %115 = vst.msk [vmem:[#allocation2] sm:$0xff] %vm114_vm2, %v109_v13  ;;  %v185_v17 = vpop.permute.xlu0 %184  ;;  %v660_v42 = vld [vmem:[#allocation2 + $0x18] sm:$0xff] }
 0x161   :  { %958 = vmatprep.mubr.f32.mxu1 %v660_v42  ;;  %v753_v42 = vld [vmem:[#allocation8 + $0x270] sm:$0xff] }
 0x163   :  { %v130_v55 = vpop.permute.xlu1 %129  ;;  %636 = vrot.lane.b32.xlu1 %v631_v18, %s1809_s22  ;;  %v754_v18 = vld [vmem:[#allocation8 + $0x278] sm:$0xff] }
 0x164   :  { %136 = vst.msk [vmem:[#allocation2] sm:$0xff] %vm135_vm3, %v130_v55  ;;  %v205_v19 = vpop.permute.xlu0 %204 }
 0x167   :  { %v212_v23 = vpop.permute.xlu1 %211  ;;  %646 = vrot.lane.b32.xlu1 %v1946_v27, %s1807_s2 }
 0x168   :  { %v218_v24 = vmul.f32 %v212_v23, %v1946_v27  ;;  %v451_v33 = vpop.permute.xlu0 %450  ;;  %v1513_v23 = vpack.c.bf16 %v754_v18, %v753_v42  ;;  %v805_v42 = vld [vmem:[#allocation8 + $0x410] sm:$0xff] }
 0x16a   :  { %220 = vst.msk [vmem:[#allocation2 + $0x10] sm:$0xff] %vm72_vm0, %v218_v24 }
 0x16b   :  { %v657_v35 = vld [vmem:[#allocation2] sm:$0xff] }
 0x16c   :  { %v144_v2 = vpop.permute.xlu1 %143  ;;  %884 = vmatmul.mubr.f32.vlgmr.msra.gmra.mrb[0].mxu0 %v657_v35  ;;  %v471_v5 = vpop.permute.xlu0 %470  ;;  %v1517_v35 = vpack.c.bf16 %v772_v28, %v771_v26 }
 0x16d   :  { %v147_v40 = vmul.f32 %v144_v2, %v1990_v15  ;;  %1486 = vmatpush3.bf16.msra.mxu0 %v1485_v29  ;;  %v789_v29 = vld [vmem:[#allocation8 + $0x390] sm:$0xff]  ;;  %v774_v2 = vld [vmem:[#allocation8 + $0x318] sm:$0xff] }
 0x16e   :  { %1488 = vmatprep.subr.bf16.mxu0 %v1487_v30  ;;  %v790_v30 = vld [vmem:[#allocation8 + $0x398] sm:$0xff] }
 0x16f   :  { %149 = vst.msk [vmem:[#allocation2 + $0x50] sm:$0xff] %vm72_vm0, %v147_v40  ;;  %v1519_v38 = vpack.c.bf16 %v790_v30, %v789_v29  ;;  %v785_v29 = vld [vmem:[#allocation8 + $0x370] sm:$0xff]  ;;  %v786_v30 = vld [vmem:[#allocation8 + $0x378] sm:$0xff] }
 0x170   :  { %169 = vst.msk [vmem:[#allocation2 + $0x50] sm:$0xff] %vm93_vm1, %v165_v12  ;;  %v770_v12 = vld [vmem:[#allocation8 + $0x2f8] sm:$0xff] }
 0x171   :  { %189 = vst.msk [vmem:[#allocation2 + $0x50] sm:$0xff] %vm114_vm2, %v185_v17  ;;  %v428_v46 = vpop.permute.xlu1 %427  ;;  %1490 = vmatpush3.bf16.msra.mxu0 %v1489_v9  ;;  %v1511_v17 = vpack.c.bf16 %v770_v12, %v769_v11 }
 0x172   :  { %209 = vst.msk [vmem:[#allocation2 + $0x50] sm:$0xff] %vm135_vm3, %v205_v19  ;;  %v434_v48 = vmul.f32 %v428_v46, %v1946_v27  ;;  %1492 = vmatprep.subr.bf16.mxu0 %v1491_v41  ;;  %v491_v57 = vpop.permute.xlu0 %490  ;;  %v803_v19 = vld [vmem:[#allocation8 + $0x400] sm:$0xff]  ;;  %v776_v46 = vld [vmem:[#allocation8 + $0x328] sm:$0xff] }
 0x173   :  { %v2173_v31 = vpack.c.bf16 %v804_v20, %v803_v19  ;;  %v791_v41 = vld [vmem:[#allocation8 + $0x3a0] sm:$0xff]  ;;  %v1525_v22 = vpack.c.bf16 %v776_v46, %v775_v39  ;;  %v801_v19 = vld [vmem:[#allocation8 + $0x3f0] sm:$0xff]  ;;  %v802_v20 = vld [vmem:[#allocation8 + $0x3f8] sm:$0xff] }
 0x174   :  { %436 = vst.msk [vmem:[#allocation2 + $0x28] sm:$0xff] %vm72_vm0, %v434_v48  ;;  %v793_v48 = vld [vmem:[#allocation8 + $0x3b0] sm:$0xff]  ;;  %v811_v46 = vld [vmem:[#allocation8 + $0x440] sm:$0xff] }
 0x175   :  { %456 = vst.msk [vmem:[#allocation2 + $0x28] sm:$0xff] %vm93_vm1, %v451_v33  ;;  %1494 = vmatpush3.bf16.msra.mxu0 %v1493_v47  ;;  %v773_v33 = vld [vmem:[#allocation8 + $0x310] sm:$0xff] }
 0x176   :  { %476 = vst.msk [vmem:[#allocation2 + $0x28] sm:$0xff] %vm114_vm2, %v471_v5  ;;  %v356_v52 = vpop.permute.xlu1 %355  ;;  %1496 = vmatprep.subr.bf16.mxu0 %v1495_v49  ;;  %v1521_v21 = vpack.c.bf16 %v774_v2, %v773_v33  ;;  %v794_v49 = vld [vmem:[#allocation8 + $0x3b8] sm:$0xff]  ;;  %v1680_v33 = vld [vmem:[#allocation6] sm:$0xff] }
 0x177   :  { %496 = vst.msk [vmem:[#allocation2 + $0x28] sm:$0xff] %vm135_vm3, %v491_v57  ;;  %v362_v58 = vmul.f32 %v356_v52, %v1946_v27  ;;  %v1527_v50 = vpack.c.bf16 %v794_v49, %v793_v48  ;;  %v795_v52 = vld [vmem:[#allocation8 + $0x3c0] sm:$0xff]  ;;  %v1681_v49 = vld [vmem:[#allocation6 + $0x8] sm:$0xff] }
 0x179   :  { %364 = vst.msk [vmem:[#allocation2 + $0x20] sm:$0xff] %vm72_vm0, %v362_v58  ;;  %v667_v60 = vld [vmem:[#allocation2 + $0x50] sm:$0xff]  ;;  %1498 = vmatpush3.bf16.msra.mxu0 %v1497_v16  ;;  %v778_v16 = vld [vmem:[#allocation8 + $0x338] sm:$0xff] }
 0x17a   :  { %v235_v63 = vpop.permute.xlu1 %234  ;;  %888 = vmatprep.mubr.f32.mxu0 %v667_v60  ;;  %1500 = vmatprep.subr.bf16.mxu0 %v1499_v53  ;;  %v796_v53 = vld [vmem:[#allocation8 + $0x3c8] sm:$0xff]  ;;  %v1529_v54 = vpack.c.bf16 %v778_v16, %v777_v51  ;;  %v815_v16 = vld [vmem:[#allocation8 + $0x460] sm:$0xff] }
 0x17b   :  { %240 = vst.msk [vmem:[#allocation2 + $0x10] sm:$0xff] %vm93_vm1, %v235_v63  ;;  %v1531_v58 = vpack.c.bf16 %v796_v53, %v795_v52  ;;  %v797_v63 = vld [vmem:[#allocation8 + $0x3d0] sm:$0xff] }
 0x17d   :  { %1502 = vmatpush3.bf16.msra.mxu0 %v1501_v62 }
 0x17e   :  { %v255_v8 = vpop.permute.xlu1 %254  ;;  %1504 = vmatprep.subr.bf16.mxu0 %v1503_v0  ;;  %v798_v0 = vld [vmem:[#allocation8 + $0x3d8] sm:$0xff] }
 0x17f   :  { %260 = vst.msk [vmem:[#allocation2 + $0x10] sm:$0xff] %vm114_vm2, %v255_v8  ;;  %v662_v1 = vld [vmem:[#allocation2 + $0x28] sm:$0xff]  ;;  %v1535_v6 = vpack.c.bf16 %v798_v0, %v797_v63 }
 0x180   :  { %v782_v8 = vld [vmem:[#allocation8 + $0x358] sm:$0xff] }
 0x181   :  { %1506 = vmatpush3.bf16.msra.mxu0 %v1505_v7  ;;  %v781_v7 = vld [vmem:[#allocation8 + $0x350] sm:$0xff] }
 0x182   :  { %v275_v13 = vpop.permute.xlu1 %274  ;;  %1508 = vmatprep.subr.bf16.mxu0 %v1507_v25  ;;  %v1537_v11 = vpack.c.bf16 %v782_v8, %v781_v7 }
 0x183   :  { %280 = vst.msk [vmem:[#allocation2 + $0x10] sm:$0xff] %vm135_vm3, %v275_v13  ;;  %v288_v55 = vpop.permute.xlu0 %287  ;;  %v783_v13 = vld [vmem:[#allocation8 + $0x360] sm:$0xff] }
 0x184   :  { %v291_v14 = vmul.f32 %v288_v55, %v1990_v15  ;;  %v806_v55 = vld [vmem:[#allocation8 + $0x418] sm:$0xff] }
 0x185   :  { %1510 = vmatpush3.bf16.msra.mxu0 %v1509_v45  ;;  %v1539_v45 = vpack.c.bf16 %v800_v10, %v799_v32  ;;  %v1551_v28 = vpack.c.bf16 %v806_v55, %v805_v42 }
 0x186   :  { %293 = vst.msk [vmem:[#allocation2 + $0x60] sm:$0xff] %vm72_vm0, %v291_v14  ;;  %v90_v24 = vpop.permute.xlu1 %89  ;;  %1512 = vmatprep.subr.bf16.mxu0 %v1511_v17  ;;  %v784_v17 = vld [vmem:[#allocation8 + $0x368] sm:$0xff] }
 0x187   :  { %95 = vst.msk [vmem:[#allocation2 + $0x48] sm:$0xff] %vm93_vm1, %v90_v24  ;;  %v1543_v24 = vpack.c.bf16 %v802_v20, %v801_v19 }
 0x188   :  { %v500_v34 = vpop.permute.xlu0 %499 }
 0x189   :  { %v506_v37 = vmul.f32 %v500_v34, %v1946_v27  ;;  %1514 = vmatpush3.bf16.msra.mxu0 %v1513_v23  ;;  %v1523_v27 = vpack.c.bf16 %v792_v43, %v791_v41  ;;  %v1541_v23 = vpack.c.bf16 %v784_v17, %v783_v13  ;;  %v809_v43 = vld [vmem:[#allocation8 + $0x430] sm:$0xff] }
 0x18a   :  { %v111_v40 = vpop.permute.xlu1 %110  ;;  %v659_v9 = vld [vmem:[#allocation2 + $0x10] sm:$0xff]  ;;  %1548 = vmatprep.subr.bf16.mxu0 %v2173_v31 }
 0x18b   :  { %508 = vst.msk [vmem:[#allocation2 + $0x30] sm:$0xff] %vm72_vm0, %v506_v37  ;;  %959 = vmatmul.mubr.f32.vlgmr.msra.gmra.mrb[0].mxu1 %v659_v9  ;;  %v808_v37 = vld [vmem:[#allocation8 + $0x428] sm:$0xff] }
 0x18c   :  { %116 = vst.msk [vmem:[#allocation2 + $0x48] sm:$0xff] %vm114_vm2, %v111_v40  ;;  %1518 = vmatpush3.bf16.msra.mxu1 %v1517_v35  ;;  %v807_v35 = vld [vmem:[#allocation8 + $0x420] sm:$0xff]  ;;  %v1545_v40 = vpack.c.bf16 %v786_v30, %v785_v29 }
 0x18d   :  { %v576_v44 = vpop.permute.xlu0 %575  ;;  %1520 = vmatprep.subr.bf16.mxu1 %v1519_v38  ;;  %v1555_v9 = vpack.c.bf16 %v808_v37, %v807_v35 }
 0x18e   :  { %v579_v47 = vmul.f32 %v576_v44, %v1990_v15  ;;  %v132_v5 = vpop.permute.xlu1 %131 }
 0x18f   :  { %137 = vst.msk [vmem:[#allocation2 + $0x48] sm:$0xff] %vm135_vm3, %v132_v5 }
 0x190   :  { %581 = vst.msk [vmem:[#allocation2 + $0x80] sm:$0xff] %vm72_vm0, %v579_v47  ;;  %1522 = vmatpush3.bf16.msra.mxu1 %v1521_v21  ;;  %v810_v21 = vld [vmem:[#allocation8 + $0x438] sm:$0xff] }
 0x191   :  { %v237_v36 = vpop.permute.xlu0 %236  ;;  %1524 = vmatprep.subr.bf16.mxu1 %v1523_v27  ;;  %v1559_v39 = vpack.c.bf16 %v810_v21, %v809_v43 }
 0x192   :  { %v379_v57 = vpop.permute.xlu1 %378 }
 0x193   :  { %384 = vst.msk [vmem:[#allocation2 + $0x20] sm:$0xff] %vm93_vm1, %v379_v57  ;;  %v816_v57 = vld [vmem:[#allocation8 + $0x468] sm:$0xff] }
 0x194   :  { %1526 = vmatpush3.bf16.msra.mxu1 %v1525_v22 }
 0x195   :  { %v257_v56 = vpop.permute.xlu0 %256  ;;  %1528 = vmatprep.subr.bf16.mxu1 %v1527_v50  ;;  %v814_v50 = vld [vmem:[#allocation8 + $0x458] sm:$0xff] }
 0x196   :  { %v399_v60 = vpop.permute.xlu1 %398  ;;  %v666_v62 = vld [vmem:[#allocation2 + $0x48] sm:$0xff] }
 0x197   :  { %404 = vst.msk [vmem:[#allocation2 + $0x20] sm:$0xff] %vm114_vm2, %v399_v60  ;;  %889 = vmatmul.mubr.f32.gmra.mrb[2].mxu0 %v666_v62 }
 0x198   :  { %1033 = vmatprep.mubr.f32.mxu0 %v662_v1  ;;  %1530 = vmatpush3.bf16.msra.mxu1 %v1529_v54  ;;  %v1571_v54 = vpack.c.bf16 %v816_v57, %v815_v16 }
 0x199   :  { %v277_v4 = vpop.permute.xlu0 %276  ;;  %1532 = vmatprep.subr.bf16.mxu1 %v1531_v58  ;;  %v817_v58 = vld [vmem:[#allocation8 + $0x470] sm:$0xff] }
 0x19a   :  { %v419_v25 = vpop.permute.xlu1 %418  ;;  %v1575_v60 = vpack.c.bf16 %v818_v59, %v817_v58 }
 0x19b   :  { %424 = vst.msk [vmem:[#allocation2 + $0x20] sm:$0xff] %vm135_vm3, %v419_v25 }
 0x19c   :  { %1534 = vmatpush3.bf16.msra.mxu1 %v1533_v3 }
 0x19d   :  { %v523_v12 = vpop.permute.xlu0 %522  ;;  %1536 = vmatprep.subr.bf16.mxu1 %v1535_v6 }
 0x19e   :  { %528 = vst.msk [vmem:[#allocation2 + $0x30] sm:$0xff] %vm93_vm1, %v523_v12  ;;  %v216_v18 = vpop.permute.xlu1 %215 }
 0x19f   :  { %v219_v14 = vmul.f32 %v216_v18, %v1990_v15 }
 0x1a0   :  { %1538 = vmatpush3.bf16.msra.mxu1 %v1537_v11 }
 0x1a1   :  { %221 = vst.msk [vmem:[#allocation2 + $0x58] sm:$0xff] %vm72_vm0, %v219_v14  ;;  %v453_v26 = vpop.permute.xlu0 %452  ;;  %1540 = vmatprep.subr.bf16.mxu1 %v1539_v45  ;;  %v1816_v45 = vmov 1.0  }
 0x1a2   :  { %241 = vst.msk [vmem:[#allocation2 + $0x58] sm:$0xff] %vm93_vm1, %v237_v36  ;;  %v661_v34 = vld [vmem:[#allocation2 + $0x20] sm:$0xff] }
 0x1a3   :  { %261 = vst.msk [vmem:[#allocation2 + $0x58] sm:$0xff] %vm114_vm2, %v257_v56  ;;  %v572_v38 = vpop.permute.xlu1 %571  ;;  %1034 = vmatmul.mubr.f32.vlgmr.msra.gmra.mrb[4].mxu0 %v661_v34  ;;  %v813_v36 = vld [vmem:[#allocation8 + $0x450] sm:$0xff] }
 0x1a4   :  { %281 = vst.msk [vmem:[#allocation2 + $0x58] sm:$0xff] %vm135_vm3, %v277_v4  ;;  %v578_v2 = vmul.f32 %v1680_v33, %v572_v38  ;;  %1550 = vmatpush3.bf16.msra.mxu0 %v2173_v31  ;;  %1542 = vmatpush3.bf16.msra.mxu1 %v1541_v23  ;;  %v812_v31 = vld [vmem:[#allocation8 + $0x448] sm:$0xff] }
 0x1a5   :  { %1552 = vmatprep.subr.bf16.mxu0 %v1551_v28  ;;  %1544 = vmatprep.subr.bf16.mxu1 %v1543_v24  ;;  %v2194_v41 = vpop.permute.xlu0 %634  ;;  %v1563_v48 = vpack.c.bf16 %v812_v31, %v811_v46 }
 0x1a6   :  { %580 = vst.msk [vmem:[#allocation2 + $0x38] sm:$0xff] %vm72_vm0, %v578_v2 }
 0x1a8   :  { %v432_v44 = vpop.permute.xlu1 %431  ;;  %1554 = vmatpush3.bf16.msra.mxu0 %v1551_v28  ;;  %1546 = vmatpush3.bf16.msra.mxu1 %v1545_v40 }
 0x1a9   :  { %v435_v27 = vmul.f32 %v432_v44, %v1990_v15  ;;  %1556 = vmatprep.subr.bf16.mxu0 %v1555_v9  ;;  %v473_v47 = vpop.permute.xlu0 %472  ;;  %v1567_v15 = vpack.c.bf16 %v814_v50, %v813_v36 }
 0x1ab   :  { %437 = vst.msk [vmem:[#allocation2 + $0x70] sm:$0xff] %vm72_vm0, %v435_v27  ;;  %v668_v7 = vld [vmem:[#allocation2 + $0x58] sm:$0xff] }
 0x1ac   :  { %457 = vst.msk [vmem:[#allocation2 + $0x70] sm:$0xff] %vm93_vm1, %v453_v26  ;;  %1558 = vmatpush3.bf16.msra.mxu0 %v1555_v9 }
 0x1ad   :  { %477 = vst.msk [vmem:[#allocation2 + $0x70] sm:$0xff] %vm114_vm2, %v473_v47  ;;  %v360_v5 = vpop.permute.xlu1 %359  ;;  %1560 = vmatprep.subr.bf16.mxu0 %v1559_v39  ;;  %v401_v53 = vpop.permute.xlu0 %400 }
 0x1ae   :  { %v363_v22 = vmul.f32 %v1681_v49, %v360_v5 }
 0x1b0   :  { %365 = vst.msk [vmem:[#allocation2 + $0x68] sm:$0xff] %vm72_vm0, %v363_v22  ;;  %1562 = vmatpush3.bf16.msra.mxu0 %v1559_v39 }
 0x1b1   :  { %1564 = vmatprep.subr.bf16.mxu0 %v1563_v48 }
 0x1b2   :  { %v504_v51 = vpop.permute.xlu1 %503 }
 0x1b3   :  { %v507_v52 = vmul.f32 %v1681_v49, %v504_v51 }
 0x1b4   :  { %1566 = vmatpush3.bf16.msra.mxu0 %v1563_v48 }
 0x1b5   :  { %509 = vst.msk [vmem:[#allocation2 + $0x78] sm:$0xff] %vm72_vm0, %v507_v52  ;;  %1568 = vmatprep.subr.bf16.mxu0 %v1567_v15 }
 0x1b6   :  { %v309_v56 = vpop.permute.xlu1 %308 }
 0x1b7   :  { %313 = vst.msk [vmem:[#allocation2 + $0x60] sm:$0xff] %vm93_vm1, %v309_v56 }
 0x1b8   :  { %v597_v61 = vpop.permute.xlu0 %596  ;;  %1570 = vmatpush3.bf16.msra.mxu0 %v1567_v15 }
 0x1b9   :  { %601 = vst.msk [vmem:[#allocation2 + $0x80] sm:$0xff] %vm93_vm1, %v597_v61  ;;  %1572 = vmatprep.subr.bf16.mxu0 %v1571_v54 }
 0x1ba   :  { %v329_v62 = vpop.permute.xlu1 %328 }
 0x1bb   :  { %333 = vst.msk [vmem:[#allocation2 + $0x60] sm:$0xff] %vm114_vm2, %v329_v62 }
 0x1bc   :  { %1574 = vmatpush3.bf16.msra.mxu0 %v1571_v54 }
 0x1bd   :  { %v525_v63 = vpop.permute.xlu0 %524  ;;  %1576 = vmatprep.subr.bf16.mxu0 %v1575_v60 }
 0x1be   :  { %529 = vst.msk [vmem:[#allocation2 + $0x78] sm:$0xff] %vm93_vm1, %v525_v63  ;;  %v349_v0 = vpop.permute.xlu1 %348 }
 0x1bf   :  { %353 = vst.msk [vmem:[#allocation2 + $0x60] sm:$0xff] %vm135_vm3, %v349_v0 }
 0x1c0   :  { %1578 = vmatpush3.bf16.msra.mxu0 %v1575_v60 }
 0x1c1   :  { %v545_v1 = vpop.permute.xlu0 %544 }
 0x1c2   :  { %v595_v3 = vpop.permute.xlu1 %594  ;;  %549 = vst.msk [vmem:[#allocation2 + $0x78] sm:$0xff] %vm114_vm2, %v545_v1 }
 0x1c3   :  { %600 = vst.msk [vmem:[#allocation2 + $0x38] sm:$0xff] %vm93_vm1, %v595_v3 }
 0x1c6   :  { %v615_v4 = vpop.permute.xlu1 %614  ;;  %v669_v6 = vld [vmem:[#allocation2 + $0x60] sm:$0xff] }
 0x1c7   :  { %620 = vst.msk [vmem:[#allocation2 + $0x38] sm:$0xff] %vm114_vm2, %v615_v4  ;;  %963 = vmatprep.mubr.f32.mxu1 %v669_v6 }
 0x1c8   :  { %640 = vst.msk [vmem:[#allocation2 + $0x38] sm:$0xff] %vm135_vm3, %v2194_v41  ;;  %964 = vmatmul.mubr.f32.gmra.mrb[2].mxu1 %v668_v7 }
 0x1ca   :  { %v543_v8 = vpop.permute.xlu1 %542 }
 0x1cb   :  { %548 = vst.msk [vmem:[#allocation2 + $0x30] sm:$0xff] %vm114_vm2, %v543_v8 }
 0x1cc   :  { %v565_v25 = vpop.permute.xlu0 %564 }
 0x1cd   :  { %569 = vst.msk [vmem:[#allocation2 + $0x78] sm:$0xff] %vm135_vm3, %v565_v25 }
 0x1ce   :  { %v381_v32 = vpop.permute.xlu1 %380 }
 0x1cf   :  { %385 = vst.msk [vmem:[#allocation2 + $0x68] sm:$0xff] %vm93_vm1, %v381_v32  ;;  %v664_v10 = vld [vmem:[#allocation2 + $0x38] sm:$0xff] }
 0x1d0   :  { %405 = vst.msk [vmem:[#allocation2 + $0x68] sm:$0xff] %vm114_vm2, %v401_v53  ;;  %1108 = vmatprep.mubr.f32.mxu1 %v664_v10  ;;  %v649_v11 = vpop.permute.xlu0 %648 }
 0x1d1   :  { %653 = vst.msk [vmem:[#allocation2 + $0x88] sm:$0xff] %vm93_vm1, %v649_v11 }
 0x1d2   :  { %v563_v12 = vpop.permute.xlu1 %562  ;;  %656 = vst.msk [vmem:[#allocation2 + $0x88] sm:$0xff] %vm654_vm4, %v1816_v45 }
 0x1d3   :  { %568 = vst.msk [vmem:[#allocation2 + $0x30] sm:$0xff] %vm135_vm3, %v563_v12 }
 0x1d4   :  { %v672_v26 = vld [vmem:[#allocation2 + $0x78] sm:$0xff] }
 0x1d6   :  { %v493_v13 = vpop.permute.xlu1 %492 }
 0x1d7   :  { %497 = vst.msk [vmem:[#allocation2 + $0x70] sm:$0xff] %vm135_vm3, %v493_v13 }
 0x1d9   :  { %v674_v28 = vld [vmem:[#allocation2 + $0x88] sm:$0xff] }
 0x1da   :  { %v421_v17 = vpop.permute.xlu1 %420  ;;  %v663_v42 = vld [vmem:[#allocation2 + $0x30] sm:$0xff] }
 0x1db   :  { %425 = vst.msk [vmem:[#allocation2 + $0x68] sm:$0xff] %vm135_vm3, %v421_v17  ;;  %1109 = vmatmul.mubr.f32.vlgmr.msra.gmra.mrb[4].mxu1 %v663_v42 }
 0x1de   :  { %v617_v18 = vpop.permute.xlu1 %616  ;;  %v671_v55 = vld [vmem:[#allocation2 + $0x70] sm:$0xff] }
 0x1df   :  { %621 = vst.msk [vmem:[#allocation2 + $0x80] sm:$0xff] %vm114_vm2, %v617_v18  ;;  %1038 = vmatprep.mubr.f32.mxu0 %v671_v55 }
 0x1e2   :  { %v637_v19 = vpop.permute.xlu1 %636  ;;  %v670_v20 = vld [vmem:[#allocation2 + $0x68] sm:$0xff] }
 0x1e3   :  { %641 = vst.msk [vmem:[#allocation2 + $0x80] sm:$0xff] %vm135_vm3, %v637_v19  ;;  %1039 = vmatmul.mubr.f32.gmra.mrb[6].mxu0 %v670_v20 }
 0x1e6   :  { %v647_v14 = vpop.permute.xlu1 %646 }
 0x1e7   :  { %652 = vst.msk [vmem:[#allocation2 + $0x40] sm:$0xff] %vm93_vm1, %v647_v14 }
 0x1e8   :  { %655 = vst.msk [vmem:[#allocation2 + $0x40] sm:$0xff] %vm654_vm4, %v1816_v45 }
 0x1ea   :  { %v673_v23 = vld [vmem:[#allocation2 + $0x80] sm:$0xff] }
 0x1eb   :  { %1113 = vmatprep.mubr.f32.mxu1 %v673_v23 }
 0x1ec   :  { %1114 = vmatmul.mubr.f32.gmra.mrb[6].mxu1 %v672_v26 }
 0x1ef   :  { %v665_v24 = vld [vmem:[#allocation2 + $0x40] sm:$0xff] }
 0x1f0   :  { %1416 = vmatprep.mubr.f32.mxu0 %v665_v24 }
 0x1f1   :  { %1417 = vmatmul.mubr.f32.vlgmr.msra.gmra.mrb[8].mxu0 %v674_v28 }
 0x23f   :  { %v1246_v29 = vpop.f32.mrb[0].mxu0 }
 0x240   :  { %v1247_v30 = vpop.f32.mrb[1].mxu0 }
 0x241   :  { %v1248_v34 = vadd.f32 %v1247_v30, %v1246_v29 }
 0x25e   :  { %v1284_v35 = vpop.f32.mrb[0].mxu1 }
 0x25f   :  { %v1285_v37 = vpop.f32.mrb[1].mxu1 }
 0x260   :  { %v1286_v38 = vadd.f32 %v1285_v37, %v1284_v35 }
 0x262   :  { %v961_v33 = vadd.f32 %v1286_v38, %v1248_v34 }
 0x26a   :  { %v1249_v2 = vpop.f32.mrb[2].mxu0 }
 0x26b   :  { %v1250_v40 = vpop.f32.mrb[3].mxu0 }
 0x26c   :  { %v1251_v9 = vadd.f32 %v1250_v40, %v1249_v2 }
 0x276   :  { %v1322_v41 = vpop.f32.mrb[4].mxu0 }
 0x277   :  { %v1323_v43 = vpop.f32.mrb[5].mxu0 }
 0x278   :  { %v1324_v21 = vadd.f32 %v1323_v43, %v1322_v41 }
 0x27a   :  { %v1036_v44 = vadd.f32 %v1324_v21, %v961_v33 }
 0x29b   :  { %v1287_v27 = vpop.f32.mrb[2].mxu1 }
 0x29c   :  { %v1288_v39 = vpop.f32.mrb[3].mxu1 }
 0x29d   :  { %v1289_v46 = vadd.f32 %v1288_v39, %v1287_v27 }
 0x29f   :  { %v966_v31 = vadd.f32 %v1289_v46, %v1251_v9 }
 0x2ae   :  { %v1360_v47 = vpop.f32.mrb[4].mxu1 }
 0x2af   :  { %v1361_v5 = vpop.f32.mrb[5].mxu1 }
 0x2b0   :  { %v1362_v48 = vadd.f32 %v1361_v5, %v1360_v47 }
 0x2b2   :  { %v1111_v49 = vadd.f32 %v1362_v48, %v1036_v44 }
 0x2b6   :  { %v1325_v22 = vpop.f32.mrb[6].mxu0 }
 0x2b7   :  { %v1326_v36 = vpop.f32.mrb[7].mxu0 }
 0x2b8   :  { %v1327_v50 = vadd.f32 %v1326_v36, %v1325_v22 }
 0x2ba   :  { %v1041_v15 = vadd.f32 %v1327_v50, %v966_v31 }
 0x2bf   :  { %v1363_v51 = vpop.f32.mrb[6].mxu1 }
 0x2c0   :  { %v1364_v16 = vpop.f32.mrb[7].mxu1 }
 0x2c1   :  { %v1365_v57 = vadd.f32 %v1364_v16, %v1363_v51 }
 0x2c3   :  { %v1116_v52 = vadd.f32 %v1365_v57, %v1041_v15 }
 0x2c4   :  { %v1418_v53 = vpop.f32.mrb[8].mxu0 }
 0x2c5   :  { %v1191_v54 = vadd.f32 %v1418_v53, %v1116_v52  ;;  %v1185_v56 = vpop.f32.mrb[9].mxu0 }
 0x2c6   :  { %v1186_v58 = vadd.f32 %v1185_v56, %v1111_v49 }
 0x2c7   :  { %1195 = vst [vmem:[#allocation9 + $0x8] sm:$0xff] %v1191_v54 }
 0x2c8   :  { %1194 = vst [vmem:[#allocation9] sm:$0xff] %v1186_v58 }
 0x2c9   :  { %1759 = shalt.err (!%p1756_p0)
}
 0x2ca   :  { %s1760_s30 = scalar_lea.hbm %s2243_s3, 256 }
 0x2cb   :  { %p1761_p1 = scmp.ne.s32.totalorder %s2243_s3, %s1760_s30  ;;  %p1764_p2 = scmp.lt.u32.totalorder %s1760_s30, %s2243_s3 }
 0x2cd   :  { %p1766_p3 = pnand %p1764_p2, %p1761_p1 }
 0x2cf   :  { %1769 = shalt.err (!%p1766_p3)
}
 0x2d0   :  { %1207 = dma.vmem_to_hbm [thread:$0]  %s1202_s26, 256, %s2243_s3, [#allocation5], %s1778_s24, %s1778_s24, %s1779_s25  }
 0x2d1   :  { %1774 = dma.done.wait [#allocation5], 256  }
 0x2d2   :  { %1775 = vsyncadd [#allocation5], 4294967040 }
 0x2d3   :  { %1211 = vsyncpa [#allocation4], 1 }
 0x2d4   :  { %1212 = vsyncpa [#allocation7], 1 }
 0x2d5   :  { %1213 = vsyncpa [#allocation5], 1 }

</bundles_post_ra>
